<compile_context>
chip_gen: v7x
topology: tpu7x:2x2x1
jax: 0.10.0
libtpu: 0.0.40
codegen_flags: <defaults>
</compile_context>

<pallas_src>
from functools import partial

import jax
import jax.numpy as jnp
from jax import lax
from jax.experimental import pallas as pl
from jax.experimental.pallas import tpu as pltpu


def attention_kernel(x_ref, wqkv_ref, bqkv_ref, wproj_ref, bproj_ref, o_ref,
                     *, num_heads, head_dim):
    H, hd = num_heads, head_dim
    Dh = H * hd

    x = x_ref[0]                                            # (N, C) bf16

    # 1) Fused QKV projection: single lane-dense MXU GEMM, f32 accumulation.
    #    The softmax scale is pre-folded into the q columns / q bias host-side.
    qkv = jnp.dot(x, wqkv_ref[...],
                  preferred_element_type=jnp.float32) + bqkv_ref[...]   # (N, 3*Dh) f32

    # 2) Per-head attention, unrolled over the head axis.  Head slices are
    #    static lane slices taken directly from the GEMM output value; the
    #    previous stack into (H, N, hd) (a second full relayout) is gone.
    head_outs = []
    for h in range(H):
        q_h = qkv[:, h * hd:(h + 1) * hd].astype(jnp.bfloat16)              # (N, hd)
        k_h = qkv[:, Dh + h * hd: Dh + (h + 1) * hd].astype(jnp.bfloat16)   # (N, hd)
        v_h = qkv[:, 2 * Dh + h * hd: 2 * Dh + (h + 1) * hd].astype(jnp.bfloat16)

        # scores = q @ k^T (contract the trailing hd dim of both operands).
        s = lax.dot_general(q_h, k_h, (((1,), (1,)), ((), ())),
                            preferred_element_type=jnp.float32)         # (N, N) f32
        s = s - jnp.max(s, axis=-1, keepdims=True)

        # exp on bf16 inputs (fast EUP path on v6e/v7x, safe f32 fallback on
        # v5e); the softmax row-sum accumulates in f32.
        p = jnp.exp(s.astype(jnp.bfloat16))                              # (N, N) bf16
        row_sum = jnp.sum(p.astype(jnp.float32), axis=-1, keepdims=True)
        inv = pl.reciprocal(row_sum, approx=True)                        # (N, 1) f32

        # PV matmul; apply the 1/l rescale to the small (N, hd) output rather
        # than the (N, N) probabilities.  attn_drop / proj_drop are 0.0.
        o_h = lax.dot_general(p, v_h, (((1,), (0,)), ((), ())),
                              preferred_element_type=jnp.float32)        # (N, hd) f32
        head_outs.append((o_h * inv).astype(jnp.bfloat16))

    # 3) Merge heads once along lanes (pure value concat -> no VMEM scratch
    #    slab, no masked sub-128-lane stores, no slab reload).
    y = jnp.concatenate(head_outs, axis=1)                               # (N, Dh) bf16

    # 4) Single fused output-projection GEMM (K = Dh, MXU-optimal).
    out = jnp.dot(y, wproj_ref[...],
                  preferred_element_type=jnp.float32) + bproj_ref[...]   # (N, C) f32
    o_ref[0] = out.astype(o_ref.dtype)


def attention_forward(x, wqkv, q_bias, v_bias, wproj, bproj, *, num_heads):
    B, N, C = x.shape
    Dh3, _C = wqkv.shape
    Dh = Dh3 // 3
    head_dim = Dh // num_heads
    scale = head_dim ** (-0.5)
    out_dtype = x.dtype

    # ---- Host-side weight prep (free, one-time) -----------------------------
    # Pre-transpose so the kernel computes plain x @ W, fold the softmax scale
    # into the q weights / q bias, build the (q_bias, 0, v_bias) qkv bias, and
    # cast matmul operands to bf16.
    col_scale = jnp.concatenate([jnp.full((Dh,), scale, wqkv.dtype),
                                 jnp.ones((2 * Dh,), wqkv.dtype)])
    wqkv_t = (wqkv.T * col_scale[None, :]).astype(jnp.bfloat16)          # (C, 3*Dh)
    wproj_t = wproj.T.astype(jnp.bfloat16)                               # (Dh, C)
    bqkv = jnp.concatenate([q_bias * scale,
                            jnp.zeros_like(v_bias),
                            v_bias]).astype(jnp.float32)[None, :]        # (1, 3*Dh)
    bproj2 = bproj.astype(jnp.float32)[None, :]                          # (1, C)
    x_bf = x.astype(jnp.bfloat16)

    kernel = partial(attention_kernel, num_heads=num_heads, head_dim=head_dim)

    # ---- Generation-aware VMEM budget ---------------------------------------
    # Cap at ~85% of physical per-core VMEM (leaves headroom for compiler
    # scratch): ~54 MiB on v7x (64 MiB/TC), ~108 MiB on v5e/v6e (128 MiB).
    try:
        vmem_cap = int(0.85 * pltpu.get_tpu_info().vmem_capacity_bytes)
    except Exception:
        vmem_cap = 64 << 20
    out_isz = jnp.dtype(out_dtype).itemsize
    est = (2 * N * C * (2 + out_isz)                     # x / out blocks (2x buffered)
           + 2 * ((C * 3 * Dh + Dh * C) * 2 + (3 * Dh + C) * 4)   # weights + biases
           + N * 3 * Dh * 4                              # qkv intermediate (f32)
           + 2 * (N * N * 6 + N * head_dim * 4)          # ~2 heads of scores/probs live
           + 2 * N * Dh * 2                              # head outputs + merged slab
           + N * C * 4)                                  # projection output (f32)
    vmem_limit = min(vmem_cap, max(32 << 20, 2 * est))

    def _run(single_buffer_weights):
        # Weights / biases have a constant index_map (never re-DMA'd); request
        # single buffering so they don't pay 2x VMEM.  Falls back to default
        # (double) buffering if this JAX version rejects pl.Buffered(1).
        def wspec(shape):
            if single_buffer_weights:
                return pl.BlockSpec(shape, lambda b: (0,) * len(shape),
                                    pipeline_mode=pl.Buffered(1))
            return pl.BlockSpec(shape, lambda b: (0,) * len(shape))

        grid_spec = pltpu.PrefetchScalarGridSpec(
            num_scalar_prefetch=0,
            grid=(B,),
            in_specs=[
                pl.BlockSpec((1, N, C), lambda b: (b, 0, 0)),   # x (per batch)
                wspec((C, 3 * Dh)),                             # qkv weight (pre-T, scale folded)
                wspec((1, 3 * Dh)),                             # qkv bias (q, 0, v)
                wspec((Dh, C)),                                 # proj weight (pre-T)
                wspec((1, C)),                                  # proj bias
            ],
            out_specs=pl.BlockSpec((1, N, C), lambda b: (b, 0, 0)),
        )
        fn = pl.pallas_call(
            kernel,
            out_shape=jax.ShapeDtypeStruct((B, N, C), out_dtype),
            grid_spec=grid_spec,
            compiler_params=pltpu.CompilerParams(
                dimension_semantics=("parallel",),
                vmem_limit_bytes=int(vmem_limit)),
        )
        return jax.block_until_ready(fn(x_bf, wqkv_t, bqkv, wproj_t, bproj2))

    try:
        return _run(True)
    except Exception:
        # pl.Buffered(1) not accepted by this JAX build -> default buffering.
        return _run(False)


def attention_reference(x, wqkv, q_bias, v_bias, wproj, bproj, *, num_heads):
    """Pure-JAX (f32) reference mirroring the PyTorch forward."""
    B, N, C = x.shape
    Dh = wqkv.shape[0] // 3
    head_dim = Dh // num_heads
    scale = head_dim ** (-0.5)

    bqkv = jnp.concatenate([q_bias, jnp.zeros_like(v_bias), v_bias])
    qkv = x @ wqkv.T + bqkv                                   # (B, N, 3*Dh)
    qkv = qkv.reshape(B, N, 3, num_heads, head_dim).transpose(2, 0, 3, 1, 4)
    q, k, v = qkv[0], qkv[1], qkv[2]                          # (B, H, N, hd)
    q = q * scale
    attn = q @ jnp.swapaxes(k, -2, -1)                        # (B, H, N, N)
    attn = jax.nn.softmax(attn, axis=-1)
    out = (attn @ v).transpose(0, 2, 1, 3).reshape(B, N, Dh)  # (B, N, Dh)
    return out @ wproj.T + bproj


if __name__ == "__main__":
    # Small shapes consistent with the module: B=2, N=8 tokens, C=dim=32,
    # num_heads=4 -> head_dim=8, all_head_dim=32.
    # (For real ViT perf, use lane-aligned shapes, e.g. N=197->256, C=768, hd=64.)
    B, N, C = 2, 8, 32
    num_heads = 4
    Dh = C  # all_head_dim

    key = jax.random.PRNGKey(0)
    kx, kw1, kb1q, kb1v, kw2, kb2 = jax.random.split(key, 6)

    x = jax.random.normal(kx, (B, N, C), dtype=jnp.float32)
    wqkv = jax.random.normal(kw1, (3 * Dh, C), dtype=jnp.float32) * 0.05
    q_bias = jax.random.normal(kb1q, (Dh,), dtype=jnp.float32) * 0.05
    v_bias = jax.random.normal(kb1v, (Dh,), dtype=jnp.float32) * 0.05
    wproj = jax.random.normal(kw2, (C, Dh), dtype=jnp.float32) * 0.05
    bproj = jax.random.normal(kb2, (C,), dtype=jnp.float32) * 0.05

    out = attention_forward(x, wqkv, q_bias, v_bias, wproj, bproj,
                            num_heads=num_heads)
    out = jax.block_until_ready(out)

    ref = attention_reference(x, wqkv, q_bias, v_bias, wproj, bproj,
                              num_heads=num_heads)
    assert out.shape == (B, N, C)
    # bf16 matmul operands + bf16 exp + approx reciprocal -> relaxed tolerance.
    assert jnp.allclose(out, ref, atol=2e-2, rtol=2e-2), "mismatch vs reference"

    print("KERNEL_OK")
</pallas_src>

<mosaic_0001>
module attributes {stable_mosaic.version = 11 : i64} {
  func.func @attention_kernel(%arg0: i32, %arg1: memref<1x8x32xbf16, #tpu.memory_space<vmem>>, %arg2: memref<32x96xbf16, #tpu.memory_space<vmem>>, %arg3: memref<1x96xf32, #tpu.memory_space<vmem>>, %arg4: memref<32x32xbf16, #tpu.memory_space<vmem>>, %arg5: memref<1x32xf32, #tpu.memory_space<vmem>>, %arg6: memref<1x8x32xf32, #tpu.memory_space<vmem>>) attributes {dimension_semantics = [#tpu.dimension_semantics<parallel>], iteration_bounds = array<i64: 2>, scalar_prefetch = 0 : i64, scratch_operands = 0 : i64, tpu.core_type = #tpu.core_type<tc>, window_params = [{transform_indices = @transform_0, window_bounds = array<i64: 1, 8, 32>}, {pipeline_mode = #tpu.pipeline_mode<synchronous>, transform_indices = @transform_1, window_bounds = array<i64: 32, 96>}, {pipeline_mode = #tpu.pipeline_mode<synchronous>, transform_indices = @transform_2, window_bounds = array<i64: 1, 96>}, {pipeline_mode = #tpu.pipeline_mode<synchronous>, transform_indices = @transform_3, window_bounds = array<i64: 32, 32>}, {pipeline_mode = #tpu.pipeline_mode<synchronous>, transform_indices = @transform_4, window_bounds = array<i64: 1, 32>}, {transform_indices = @transform_5, window_bounds = array<i64: 1, 8, 32>}]} {
    %c0 = arith.constant 0 : index
    %c0_0 = arith.constant 0 : index
    %c0_1 = arith.constant 0 : index
    %0 = vector.load %arg1[%c0, %c0_0, %c0_1] : memref<1x8x32xbf16, #tpu.memory_space<vmem>>, vector<1x8x32xbf16>
    %1 = vector.shape_cast %0 : vector<1x8x32xbf16> to vector<8x32xbf16>
    %c0_2 = arith.constant 0 : index
    %c0_3 = arith.constant 0 : index
    %2 = vector.load %arg2[%c0_2, %c0_3] : memref<32x96xbf16, #tpu.memory_space<vmem>>, vector<32x96xbf16>
    %cst = arith.constant dense<0.000000e+00> : vector<8x96xf32>
    %3 = tpu.matmul %1, %2, %cst {dimension_numbers = #tpu.dot_dimension_numbers<[1], [0], [0], [1], [0, 0, 1, 1], [], []>} : vector<8x32xbf16>, vector<32x96xbf16>, vector<8x96xf32> -> vector<8x96xf32>
    %c0_4 = arith.constant 0 : index
    %c0_5 = arith.constant 0 : index
    %4 = vector.load %arg3[%c0_4, %c0_5] : memref<1x96xf32, #tpu.memory_space<vmem>>, vector<1x96xf32>
    %5 = vector.broadcast %4 : vector<1x96xf32> to vector<8x96xf32>
    %6 = arith.addf %3, %5 : vector<8x96xf32>
    %7 = vector.extract_strided_slice %6 {offsets = [0, 0], sizes = [8, 8], strides = [1, 1]} : vector<8x96xf32> to vector<8x8xf32>
    %8 = arith.truncf %7 : vector<8x8xf32> to vector<8x8xbf16>
    %9 = vector.extract_strided_slice %6 {offsets = [0, 32], sizes = [8, 8], strides = [1, 1]} : vector<8x96xf32> to vector<8x8xf32>
    %10 = arith.truncf %9 : vector<8x8xf32> to vector<8x8xbf16>
    %11 = vector.extract_strided_slice %6 {offsets = [0, 64], sizes = [8, 8], strides = [1, 1]} : vector<8x96xf32> to vector<8x8xf32>
    %12 = arith.truncf %11 : vector<8x8xf32> to vector<8x8xbf16>
    %cst_6 = arith.constant dense<0.000000e+00> : vector<8x8xf32>
    %13 = tpu.matmul %8, %10, %cst_6 {dimension_numbers = #tpu.dot_dimension_numbers<[1], [1], [0], [0], [0, 0, 1, 0], [], []>} : vector<8x8xbf16>, vector<8x8xbf16>, vector<8x8xf32> -> vector<8x8xf32>
    %cst_7 = arith.constant dense<0xFF800000> : vector<8xf32>
    %14 = vector.multi_reduction <maximumf>, %13, %cst_7 [1] : vector<8x8xf32> to vector<8xf32>
    %15 = vector.shape_cast %14 : vector<8xf32> to vector<8x1xf32>
    %16 = vector.broadcast %15 : vector<8x1xf32> to vector<8x8xf32>
    %17 = arith.subf %13, %16 : vector<8x8xf32>
    %18 = arith.truncf %17 : vector<8x8xf32> to vector<8x8xbf16>
    %19 = math.exp %18 : vector<8x8xbf16>
    %20 = arith.extf %19 : vector<8x8xbf16> to vector<8x8xf32>
    %cst_8 = arith.constant dense<0.000000e+00> : vector<8xf32>
    %21 = vector.multi_reduction <add>, %20, %cst_8 [1] : vector<8x8xf32> to vector<8xf32>
    %22 = vector.shape_cast %21 : vector<8xf32> to vector<8x1xf32>
    %23 = tpu.reciprocal %22 {approx = true} : vector<8x1xf32> -> vector<8x1xf32>
    %cst_9 = arith.constant dense<0.000000e+00> : vector<8x8xf32>
    %24 = tpu.matmul %19, %12, %cst_9 {dimension_numbers = #tpu.dot_dimension_numbers<[1], [0], [0], [1], [0, 0, 1, 1], [], []>} : vector<8x8xbf16>, vector<8x8xbf16>, vector<8x8xf32> -> vector<8x8xf32>
    %25 = vector.broadcast %23 : vector<8x1xf32> to vector<8x8xf32>
    %26 = arith.mulf %24, %25 : vector<8x8xf32>
    %27 = arith.truncf %26 : vector<8x8xf32> to vector<8x8xbf16>
    %28 = vector.extract_strided_slice %6 {offsets = [0, 8], sizes = [8, 8], strides = [1, 1]} : vector<8x96xf32> to vector<8x8xf32>
    %29 = arith.truncf %28 : vector<8x8xf32> to vector<8x8xbf16>
    %30 = vector.extract_strided_slice %6 {offsets = [0, 40], sizes = [8, 8], strides = [1, 1]} : vector<8x96xf32> to vector<8x8xf32>
    %31 = arith.truncf %30 : vector<8x8xf32> to vector<8x8xbf16>
    %32 = vector.extract_strided_slice %6 {offsets = [0, 72], sizes = [8, 8], strides = [1, 1]} : vector<8x96xf32> to vector<8x8xf32>
    %33 = arith.truncf %32 : vector<8x8xf32> to vector<8x8xbf16>
    %cst_10 = arith.constant dense<0.000000e+00> : vector<8x8xf32>
    %34 = tpu.matmul %29, %31, %cst_10 {dimension_numbers = #tpu.dot_dimension_numbers<[1], [1], [0], [0], [0, 0, 1, 0], [], []>} : vector<8x8xbf16>, vector<8x8xbf16>, vector<8x8xf32> -> vector<8x8xf32>
    %cst_11 = arith.constant dense<0xFF800000> : vector<8xf32>
    %35 = vector.multi_reduction <maximumf>, %34, %cst_11 [1] : vector<8x8xf32> to vector<8xf32>
    %36 = vector.shape_cast %35 : vector<8xf32> to vector<8x1xf32>
    %37 = vector.broadcast %36 : vector<8x1xf32> to vector<8x8xf32>
    %38 = arith.subf %34, %37 : vector<8x8xf32>
    %39 = arith.truncf %38 : vector<8x8xf32> to vector<8x8xbf16>
    %40 = math.exp %39 : vector<8x8xbf16>
    %41 = arith.extf %40 : vector<8x8xbf16> to vector<8x8xf32>
    %cst_12 = arith.constant dense<0.000000e+00> : vector<8xf32>
    %42 = vector.multi_reduction <add>, %41, %cst_12 [1] : vector<8x8xf32> to vector<8xf32>
    %43 = vector.shape_cast %42 : vector<8xf32> to vector<8x1xf32>
    %44 = tpu.reciprocal %43 {approx = true} : vector<8x1xf32> -> vector<8x1xf32>
    %cst_13 = arith.constant dense<0.000000e+00> : vector<8x8xf32>
    %45 = tpu.matmul %40, %33, %cst_13 {dimension_numbers = #tpu.dot_dimension_numbers<[1], [0], [0], [1], [0, 0, 1, 1], [], []>} : vector<8x8xbf16>, vector<8x8xbf16>, vector<8x8xf32> -> vector<8x8xf32>
    %46 = vector.broadcast %44 : vector<8x1xf32> to vector<8x8xf32>
    %47 = arith.mulf %45, %46 : vector<8x8xf32>
    %48 = arith.truncf %47 : vector<8x8xf32> to vector<8x8xbf16>
    %49 = vector.extract_strided_slice %6 {offsets = [0, 16], sizes = [8, 8], strides = [1, 1]} : vector<8x96xf32> to vector<8x8xf32>
    %50 = arith.truncf %49 : vector<8x8xf32> to vector<8x8xbf16>
    %51 = vector.extract_strided_slice %6 {offsets = [0, 48], sizes = [8, 8], strides = [1, 1]} : vector<8x96xf32> to vector<8x8xf32>
    %52 = arith.truncf %51 : vector<8x8xf32> to vector<8x8xbf16>
    %53 = vector.extract_strided_slice %6 {offsets = [0, 80], sizes = [8, 8], strides = [1, 1]} : vector<8x96xf32> to vector<8x8xf32>
    %54 = arith.truncf %53 : vector<8x8xf32> to vector<8x8xbf16>
    %cst_14 = arith.constant dense<0.000000e+00> : vector<8x8xf32>
    %55 = tpu.matmul %50, %52, %cst_14 {dimension_numbers = #tpu.dot_dimension_numbers<[1], [1], [0], [0], [0, 0, 1, 0], [], []>} : vector<8x8xbf16>, vector<8x8xbf16>, vector<8x8xf32> -> vector<8x8xf32>
    %cst_15 = arith.constant dense<0xFF800000> : vector<8xf32>
    %56 = vector.multi_reduction <maximumf>, %55, %cst_15 [1] : vector<8x8xf32> to vector<8xf32>
    %57 = vector.shape_cast %56 : vector<8xf32> to vector<8x1xf32>
    %58 = vector.broadcast %57 : vector<8x1xf32> to vector<8x8xf32>
    %59 = arith.subf %55, %58 : vector<8x8xf32>
    %60 = arith.truncf %59 : vector<8x8xf32> to vector<8x8xbf16>
    %61 = math.exp %60 : vector<8x8xbf16>
    %62 = arith.extf %61 : vector<8x8xbf16> to vector<8x8xf32>
    %cst_16 = arith.constant dense<0.000000e+00> : vector<8xf32>
    %63 = vector.multi_reduction <add>, %62, %cst_16 [1] : vector<8x8xf32> to vector<8xf32>
    %64 = vector.shape_cast %63 : vector<8xf32> to vector<8x1xf32>
    %65 = tpu.reciprocal %64 {approx = true} : vector<8x1xf32> -> vector<8x1xf32>
    %cst_17 = arith.constant dense<0.000000e+00> : vector<8x8xf32>
    %66 = tpu.matmul %61, %54, %cst_17 {dimension_numbers = #tpu.dot_dimension_numbers<[1], [0], [0], [1], [0, 0, 1, 1], [], []>} : vector<8x8xbf16>, vector<8x8xbf16>, vector<8x8xf32> -> vector<8x8xf32>
    %67 = vector.broadcast %65 : vector<8x1xf32> to vector<8x8xf32>
    %68 = arith.mulf %66, %67 : vector<8x8xf32>
    %69 = arith.truncf %68 : vector<8x8xf32> to vector<8x8xbf16>
    %70 = vector.extract_strided_slice %6 {offsets = [0, 24], sizes = [8, 8], strides = [1, 1]} : vector<8x96xf32> to vector<8x8xf32>
    %71 = arith.truncf %70 : vector<8x8xf32> to vector<8x8xbf16>
    %72 = vector.extract_strided_slice %6 {offsets = [0, 56], sizes = [8, 8], strides = [1, 1]} : vector<8x96xf32> to vector<8x8xf32>
    %73 = arith.truncf %72 : vector<8x8xf32> to vector<8x8xbf16>
    %74 = vector.extract_strided_slice %6 {offsets = [0, 88], sizes = [8, 8], strides = [1, 1]} : vector<8x96xf32> to vector<8x8xf32>
    %75 = arith.truncf %74 : vector<8x8xf32> to vector<8x8xbf16>
    %cst_18 = arith.constant dense<0.000000e+00> : vector<8x8xf32>
    %76 = tpu.matmul %71, %73, %cst_18 {dimension_numbers = #tpu.dot_dimension_numbers<[1], [1], [0], [0], [0, 0, 1, 0], [], []>} : vector<8x8xbf16>, vector<8x8xbf16>, vector<8x8xf32> -> vector<8x8xf32>
    %cst_19 = arith.constant dense<0xFF800000> : vector<8xf32>
    %77 = vector.multi_reduction <maximumf>, %76, %cst_19 [1] : vector<8x8xf32> to vector<8xf32>
    %78 = vector.shape_cast %77 : vector<8xf32> to vector<8x1xf32>
    %79 = vector.broadcast %78 : vector<8x1xf32> to vector<8x8xf32>
    %80 = arith.subf %76, %79 : vector<8x8xf32>
    %81 = arith.truncf %80 : vector<8x8xf32> to vector<8x8xbf16>
    %82 = math.exp %81 : vector<8x8xbf16>
    %83 = arith.extf %82 : vector<8x8xbf16> to vector<8x8xf32>
    %cst_20 = arith.constant dense<0.000000e+00> : vector<8xf32>
    %84 = vector.multi_reduction <add>, %83, %cst_20 [1] : vector<8x8xf32> to vector<8xf32>
    %85 = vector.shape_cast %84 : vector<8xf32> to vector<8x1xf32>
    %86 = tpu.reciprocal %85 {approx = true} : vector<8x1xf32> -> vector<8x1xf32>
    %cst_21 = arith.constant dense<0.000000e+00> : vector<8x8xf32>
    %87 = tpu.matmul %82, %75, %cst_21 {dimension_numbers = #tpu.dot_dimension_numbers<[1], [0], [0], [1], [0, 0, 1, 1], [], []>} : vector<8x8xbf16>, vector<8x8xbf16>, vector<8x8xf32> -> vector<8x8xf32>
    %88 = vector.broadcast %86 : vector<8x1xf32> to vector<8x8xf32>
    %89 = arith.mulf %87, %88 : vector<8x8xf32>
    %90 = arith.truncf %89 : vector<8x8xf32> to vector<8x8xbf16>
    %91 = tpu.concatenate %27, %48, %69, %90 in 1 : vector<8x8xbf16>, vector<8x8xbf16>, vector<8x8xbf16>, vector<8x8xbf16> -> vector<8x32xbf16>
    %c0_22 = arith.constant 0 : index
    %c0_23 = arith.constant 0 : index
    %92 = vector.load %arg4[%c0_22, %c0_23] : memref<32x32xbf16, #tpu.memory_space<vmem>>, vector<32x32xbf16>
    %cst_24 = arith.constant dense<0.000000e+00> : vector<8x32xf32>
    %93 = tpu.matmul %91, %92, %cst_24 {dimension_numbers = #tpu.dot_dimension_numbers<[1], [0], [0], [1], [0, 0, 1, 1], [], []>} : vector<8x32xbf16>, vector<32x32xbf16>, vector<8x32xf32> -> vector<8x32xf32>
    %c0_25 = arith.constant 0 : index
    %c0_26 = arith.constant 0 : index
    %94 = vector.load %arg5[%c0_25, %c0_26] : memref<1x32xf32, #tpu.memory_space<vmem>>, vector<1x32xf32>
    %95 = vector.broadcast %94 : vector<1x32xf32> to vector<8x32xf32>
    %96 = arith.addf %93, %95 : vector<8x32xf32>
    %c0_27 = arith.constant 0 : index
    %c0_28 = arith.constant 0 : index
    %c0_29 = arith.constant 0 : index
    %97 = vector.load %arg6[%c0_27, %c0_28, %c0_29] : memref<1x8x32xf32, #tpu.memory_space<vmem>>, vector<1x8x32xf32>
    %98 = vector.shape_cast %97 : vector<1x8x32xf32> to vector<8x32xf32>
    %99 = vector.shape_cast %96 : vector<8x32xf32> to vector<1x8x32xf32>
    tpu.vector_store %arg6[%c0_27, %c0_28, %c0_29], %99 {strides = array<i32>} : memref<1x8x32xf32, #tpu.memory_space<vmem>>, vector<1x8x32xf32>,
    return
  }
  func.func @transform_0(%arg0: i32) -> (i32, i32, i32) {
    %c0_i32 = arith.constant 0 : i32
    %c0_i32_0 = arith.constant 0 : i32
    %c0_i32_1 = arith.constant 0 : i32
    return %arg0, %c0_i32, %c0_i32_0 : i32, i32, i32
  }
  func.func @transform_1(%arg0: i32) -> (i32, i32) {
    %c0_i32 = arith.constant 0 : i32
    %c0_i32_0 = arith.constant 0 : i32
    %c0_i32_1 = arith.constant 0 : i32
    return %c0_i32, %c0_i32_0 : i32, i32
  }
  func.func @transform_2(%arg0: i32) -> (i32, i32) {
    %c0_i32 = arith.constant 0 : i32
    %c0_i32_0 = arith.constant 0 : i32
    %c0_i32_1 = arith.constant 0 : i32
    return %c0_i32, %c0_i32_0 : i32, i32
  }
  func.func @transform_3(%arg0: i32) -> (i32, i32) {
    %c0_i32 = arith.constant 0 : i32
    %c0_i32_0 = arith.constant 0 : i32
    %c0_i32_1 = arith.constant 0 : i32
    return %c0_i32, %c0_i32_0 : i32, i32
  }
  func.func @transform_4(%arg0: i32) -> (i32, i32) {
    %c0_i32 = arith.constant 0 : i32
    %c0_i32_0 = arith.constant 0 : i32
    %c0_i32_1 = arith.constant 0 : i32
    return %c0_i32, %c0_i32_0 : i32, i32
  }
  func.func @transform_5(%arg0: i32) -> (i32, i32, i32) {
    %c0_i32 = arith.constant 0 : i32
    %c0_i32_0 = arith.constant 0 : i32
    %c0_i32_1 = arith.constant 0 : i32
    return %arg0, %c0_i32, %c0_i32_0 : i32, i32, i32
  }
}

module attributes {stable_mosaic.version = 11 : i64} {
  func.func @attention_kernel(%arg0: i32, %arg1: memref<1x8x32xbf16, #tpu.memory_space<vmem>>, %arg2: memref<32x96xbf16, #tpu.memory_space<vmem>>, %arg3: memref<1x96xf32, #tpu.memory_space<vmem>>, %arg4: memref<32x32xbf16, #tpu.memory_space<vmem>>, %arg5: memref<1x32xf32, #tpu.memory_space<vmem>>, %arg6: memref<1x8x32xf32, #tpu.memory_space<vmem>>) attributes {dimension_semantics = [#tpu.dimension_semantics<parallel>], iteration_bounds = array<i64: 2>, scalar_prefetch = 0 : i64, scratch_operands = 0 : i64, tpu.core_type = #tpu.core_type<tc>, window_params = [{transform_indices = @transform_0, window_bounds = array<i64: 1, 8, 32>}, {pipeline_mode = #tpu.pipeline_mode<synchronous>, transform_indices = @transform_1, window_bounds = array<i64: 32, 96>}, {pipeline_mode = #tpu.pipeline_mode<synchronous>, transform_indices = @transform_2, window_bounds = array<i64: 1, 96>}, {pipeline_mode = #tpu.pipeline_mode<synchronous>, transform_indices = @transform_3, window_bounds = array<i64: 32, 32>}, {pipeline_mode = #tpu.pipeline_mode<synchronous>, transform_indices = @transform_4, window_bounds = array<i64: 1, 32>}, {transform_indices = @transform_5, window_bounds = array<i64: 1, 8, 32>}]} {
    %c0 = arith.constant 0 : index
    %c0_0 = arith.constant 0 : index
    %c0_1 = arith.constant 0 : index
    %0 = vector.load %arg1[%c0, %c0_0, %c0_1] : memref<1x8x32xbf16, #tpu.memory_space<vmem>>, vector<1x8x32xbf16>
    %1 = vector.shape_cast %0 : vector<1x8x32xbf16> to vector<8x32xbf16>
    %c0_2 = arith.constant 0 : index
    %c0_3 = arith.constant 0 : index
    %2 = vector.load %arg2[%c0_2, %c0_3] : memref<32x96xbf16, #tpu.memory_space<vmem>>, vector<32x96xbf16>
    %cst = arith.constant dense<0.000000e+00> : vector<8x96xf32>
    %3 = tpu.matmul %1, %2, %cst {dimension_numbers = #tpu.dot_dimension_numbers<[1], [0], [0], [1], [0, 0, 1, 1], [], []>} : vector<8x32xbf16>, vector<32x96xbf16>, vector<8x96xf32> -> vector<8x96xf32>
    %c0_4 = arith.constant 0 : index
    %c0_5 = arith.constant 0 : index
    %4 = vector.load %arg3[%c0_4, %c0_5] : memref<1x96xf32, #tpu.memory_space<vmem>>, vector<1x96xf32>
    %5 = vector.broadcast %4 : vector<1x96xf32> to vector<8x96xf32>
    %6 = arith.addf %3, %5 : vector<8x96xf32>
    %7 = vector.extract_strided_slice %6 {offsets = [0, 0], sizes = [8, 8], strides = [1, 1]} : vector<8x96xf32> to vector<8x8xf32>
    %8 = arith.truncf %7 : vector<8x8xf32> to vector<8x8xbf16>
    %9 = vector.extract_strided_slice %6 {offsets = [0, 32], sizes = [8, 8], strides = [1, 1]} : vector<8x96xf32> to vector<8x8xf32>
    %10 = arith.truncf %9 : vector<8x8xf32> to vector<8x8xbf16>
    %11 = vector.extract_strided_slice %6 {offsets = [0, 64], sizes = [8, 8], strides = [1, 1]} : vector<8x96xf32> to vector<8x8xf32>
    %12 = arith.truncf %11 : vector<8x8xf32> to vector<8x8xbf16>
    %cst_6 = arith.constant dense<0.000000e+00> : vector<8x8xf32>
    %13 = tpu.matmul %8, %10, %cst_6 {dimension_numbers = #tpu.dot_dimension_numbers<[1], [1], [0], [0], [0, 0, 1, 0], [], []>} : vector<8x8xbf16>, vector<8x8xbf16>, vector<8x8xf32> -> vector<8x8xf32>
    %cst_7 = arith.constant dense<0xFF800000> : vector<8xf32>
    %14 = vector.multi_reduction <maximumf>, %13, %cst_7 [1] : vector<8x8xf32> to vector<8xf32>
    %15 = vector.shape_cast %14 : vector<8xf32> to vector<8x1xf32>
    %16 = vector.broadcast %15 : vector<8x1xf32> to vector<8x8xf32>
    %17 = arith.subf %13, %16 : vector<8x8xf32>
    %18 = arith.truncf %17 : vector<8x8xf32> to vector<8x8xbf16>
    %19 = math.exp %18 : vector<8x8xbf16>
    %20 = arith.extf %19 : vector<8x8xbf16> to vector<8x8xf32>
    %cst_8 = arith.constant dense<0.000000e+00> : vector<8xf32>
    %21 = vector.multi_reduction <add>, %20, %cst_8 [1] : vector<8x8xf32> to vector<8xf32>
    %22 = vector.shape_cast %21 : vector<8xf32> to vector<8x1xf32>
    %23 = tpu.reciprocal %22 {approx = true} : vector<8x1xf32> -> vector<8x1xf32>
    %cst_9 = arith.constant dense<0.000000e+00> : vector<8x8xf32>
    %24 = tpu.matmul %19, %12, %cst_9 {dimension_numbers = #tpu.dot_dimension_numbers<[1], [0], [0], [1], [0, 0, 1, 1], [], []>} : vector<8x8xbf16>, vector<8x8xbf16>, vector<8x8xf32> -> vector<8x8xf32>
    %25 = vector.broadcast %23 : vector<8x1xf32> to vector<8x8xf32>
    %26 = arith.mulf %24, %25 : vector<8x8xf32>
    %27 = arith.truncf %26 : vector<8x8xf32> to vector<8x8xbf16>
    %28 = vector.extract_strided_slice %6 {offsets = [0, 8], sizes = [8, 8], strides = [1, 1]} : vector<8x96xf32> to vector<8x8xf32>
    %29 = arith.truncf %28 : vector<8x8xf32> to vector<8x8xbf16>
    %30 = vector.extract_strided_slice %6 {offsets = [0, 40], sizes = [8, 8], strides = [1, 1]} : vector<8x96xf32> to vector<8x8xf32>
    %31 = arith.truncf %30 : vector<8x8xf32> to vector<8x8xbf16>
    %32 = vector.extract_strided_slice %6 {offsets = [0, 72], sizes = [8, 8], strides = [1, 1]} : vector<8x96xf32> to vector<8x8xf32>
    %33 = arith.truncf %32 : vector<8x8xf32> to vector<8x8xbf16>
    %cst_10 = arith.constant dense<0.000000e+00> : vector<8x8xf32>
    %34 = tpu.matmul %29, %31, %cst_10 {dimension_numbers = #tpu.dot_dimension_numbers<[1], [1], [0], [0], [0, 0, 1, 0], [], []>} : vector<8x8xbf16>, vector<8x8xbf16>, vector<8x8xf32> -> vector<8x8xf32>
    %cst_11 = arith.constant dense<0xFF800000> : vector<8xf32>
    %35 = vector.multi_reduction <maximumf>, %34, %cst_11 [1] : vector<8x8xf32> to vector<8xf32>
    %36 = vector.shape_cast %35 : vector<8xf32> to vector<8x1xf32>
    %37 = vector.broadcast %36 : vector<8x1xf32> to vector<8x8xf32>
    %38 = arith.subf %34, %37 : vector<8x8xf32>
    %39 = arith.truncf %38 : vector<8x8xf32> to vector<8x8xbf16>
    %40 = math.exp %39 : vector<8x8xbf16>
    %41 = arith.extf %40 : vector<8x8xbf16> to vector<8x8xf32>
    %cst_12 = arith.constant dense<0.000000e+00> : vector<8xf32>
    %42 = vector.multi_reduction <add>, %41, %cst_12 [1] : vector<8x8xf32> to vector<8xf32>
    %43 = vector.shape_cast %42 : vector<8xf32> to vector<8x1xf32>
    %44 = tpu.reciprocal %43 {approx = true} : vector<8x1xf32> -> vector<8x1xf32>
    %cst_13 = arith.constant dense<0.000000e+00> : vector<8x8xf32>
    %45 = tpu.matmul %40, %33, %cst_13 {dimension_numbers = #tpu.dot_dimension_numbers<[1], [0], [0], [1], [0, 0, 1, 1], [], []>} : vector<8x8xbf16>, vector<8x8xbf16>, vector<8x8xf32> -> vector<8x8xf32>
    %46 = vector.broadcast %44 : vector<8x1xf32> to vector<8x8xf32>
    %47 = arith.mulf %45, %46 : vector<8x8xf32>
    %48 = arith.truncf %47 : vector<8x8xf32> to vector<8x8xbf16>
    %49 = vector.extract_strided_slice %6 {offsets = [0, 16], sizes = [8, 8], strides = [1, 1]} : vector<8x96xf32> to vector<8x8xf32>
    %50 = arith.truncf %49 : vector<8x8xf32> to vector<8x8xbf16>
    %51 = vector.extract_strided_slice %6 {offsets = [0, 48], sizes = [8, 8], strides = [1, 1]} : vector<8x96xf32> to vector<8x8xf32>
    %52 = arith.truncf %51 : vector<8x8xf32> to vector<8x8xbf16>
    %53 = vector.extract_strided_slice %6 {offsets = [0, 80], sizes = [8, 8], strides = [1, 1]} : vector<8x96xf32> to vector<8x8xf32>
    %54 = arith.truncf %53 : vector<8x8xf32> to vector<8x8xbf16>
    %cst_14 = arith.constant dense<0.000000e+00> : vector<8x8xf32>
    %55 = tpu.matmul %50, %52, %cst_14 {dimension_numbers = #tpu.dot_dimension_numbers<[1], [1], [0], [0], [0, 0, 1, 0], [], []>} : vector<8x8xbf16>, vector<8x8xbf16>, vector<8x8xf32> -> vector<8x8xf32>
    %cst_15 = arith.constant dense<0xFF800000> : vector<8xf32>
    %56 = vector.multi_reduction <maximumf>, %55, %cst_15 [1] : vector<8x8xf32> to vector<8xf32>
    %57 = vector.shape_cast %56 : vector<8xf32> to vector<8x1xf32>
    %58 = vector.broadcast %57 : vector<8x1xf32> to vector<8x8xf32>
    %59 = arith.subf %55, %58 : vector<8x8xf32>
    %60 = arith.truncf %59 : vector<8x8xf32> to vector<8x8xbf16>
    %61 = math.exp %60 : vector<8x8xbf16>
    %62 = arith.extf %61 : vector<8x8xbf16> to vector<8x8xf32>
    %cst_16 = arith.constant dense<0.000000e+00> : vector<8xf32>
    %63 = vector.multi_reduction <add>, %62, %cst_16 [1] : vector<8x8xf32> to vector<8xf32>
    %64 = vector.shape_cast %63 : vector<8xf32> to vector<8x1xf32>
    %65 = tpu.reciprocal %64 {approx = true} : vector<8x1xf32> -> vector<8x1xf32>
    %cst_17 = arith.constant dense<0.000000e+00> : vector<8x8xf32>
    %66 = tpu.matmul %61, %54, %cst_17 {dimension_numbers = #tpu.dot_dimension_numbers<[1], [0], [0], [1], [0, 0, 1, 1], [], []>} : vector<8x8xbf16>, vector<8x8xbf16>, vector<8x8xf32> -> vector<8x8xf32>
    %67 = vector.broadcast %65 : vector<8x1xf32> to vector<8x8xf32>
    %68 = arith.mulf %66, %67 : vector<8x8xf32>
    %69 = arith.truncf %68 : vector<8x8xf32> to vector<8x8xbf16>
    %70 = vector.extract_strided_slice %6 {offsets = [0, 24], sizes = [8, 8], strides = [1, 1]} : vector<8x96xf32> to vector<8x8xf32>
    %71 = arith.truncf %70 : vector<8x8xf32> to vector<8x8xbf16>
    %72 = vector.extract_strided_slice %6 {offsets = [0, 56], sizes = [8, 8], strides = [1, 1]} : vector<8x96xf32> to vector<8x8xf32>
    %73 = arith.truncf %72 : vector<8x8xf32> to vector<8x8xbf16>
    %74 = vector.extract_strided_slice %6 {offsets = [0, 88], sizes = [8, 8], strides = [1, 1]} : vector<8x96xf32> to vector<8x8xf32>
    %75 = arith.truncf %74 : vector<8x8xf32> to vector<8x8xbf16>
    %cst_18 = arith.constant dense<0.000000e+00> : vector<8x8xf32>
    %76 = tpu.matmul %71, %73, %cst_18 {dimension_numbers = #tpu.dot_dimension_numbers<[1], [1], [0], [0], [0, 0, 1, 0], [], []>} : vector<8x8xbf16>, vector<8x8xbf16>, vector<8x8xf32> -> vector<8x8xf32>
    %cst_19 = arith.constant dense<0xFF800000> : vector<8xf32>
    %77 = vector.multi_reduction <maximumf>, %76, %cst_19 [1] : vector<8x8xf32> to vector<8xf32>
    %78 = vector.shape_cast %77 : vector<8xf32> to vector<8x1xf32>
    %79 = vector.broadcast %78 : vector<8x1xf32> to vector<8x8xf32>
    %80 = arith.subf %76, %79 : vector<8x8xf32>
    %81 = arith.truncf %80 : vector<8x8xf32> to vector<8x8xbf16>
    %82 = math.exp %81 : vector<8x8xbf16>
    %83 = arith.extf %82 : vector<8x8xbf16> to vector<8x8xf32>
    %cst_20 = arith.constant dense<0.000000e+00> : vector<8xf32>
    %84 = vector.multi_reduction <add>, %83, %cst_20 [1] : vector<8x8xf32> to vector<8xf32>
    %85 = vector.shape_cast %84 : vector<8xf32> to vector<8x1xf32>
    %86 = tpu.reciprocal %85 {approx = true} : vector<8x1xf32> -> vector<8x1xf32>
    %cst_21 = arith.constant dense<0.000000e+00> : vector<8x8xf32>
    %87 = tpu.matmul %82, %75, %cst_21 {dimension_numbers = #tpu.dot_dimension_numbers<[1], [0], [0], [1], [0, 0, 1, 1], [], []>} : vector<8x8xbf16>, vector<8x8xbf16>, vector<8x8xf32> -> vector<8x8xf32>
    %88 = vector.broadcast %86 : vector<8x1xf32> to vector<8x8xf32>
    %89 = arith.mulf %87, %88 : vector<8x8xf32>
    %90 = arith.truncf %89 : vector<8x8xf32> to vector<8x8xbf16>
    %91 = tpu.concatenate %27, %48, %69, %90 in 1 : vector<8x8xbf16>, vector<8x8xbf16>, vector<8x8xbf16>, vector<8x8xbf16> -> vector<8x32xbf16>
    %c0_22 = arith.constant 0 : index
    %c0_23 = arith.constant 0 : index
    %92 = vector.load %arg4[%c0_22, %c0_23] : memref<32x32xbf16, #tpu.memory_space<vmem>>, vector<32x32xbf16>
    %cst_24 = arith.constant dense<0.000000e+00> : vector<8x32xf32>
    %93 = tpu.matmul %91, %92, %cst_24 {dimension_numbers = #tpu.dot_dimension_numbers<[1], [0], [0], [1], [0, 0, 1, 1], [], []>} : vector<8x32xbf16>, vector<32x32xbf16>, vector<8x32xf32> -> vector<8x32xf32>
    %c0_25 = arith.constant 0 : index
    %c0_26 = arith.constant 0 : index
    %94 = vector.load %arg5[%c0_25, %c0_26] : memref<1x32xf32, #tpu.memory_space<vmem>>, vector<1x32xf32>
    %95 = vector.broadcast %94 : vector<1x32xf32> to vector<8x32xf32>
    %96 = arith.addf %93, %95 : vector<8x32xf32>
    %c0_27 = arith.constant 0 : index
    %c0_28 = arith.constant 0 : index
    %c0_29 = arith.constant 0 : index
    %97 = vector.load %arg6[%c0_27, %c0_28, %c0_29] : memref<1x8x32xf32, #tpu.memory_space<vmem>>, vector<1x8x32xf32>
    %98 = vector.shape_cast %97 : vector<1x8x32xf32> to vector<8x32xf32>
    %99 = vector.shape_cast %96 : vector<8x32xf32> to vector<1x8x32xf32>
    tpu.vector_store %arg6[%c0_27, %c0_28, %c0_29], %99 {strides = array<i32>} : memref<1x8x32xf32, #tpu.memory_space<vmem>>, vector<1x8x32xf32>,
    return
  }
  func.func @transform_0(%arg0: i32) -> (i32, i32, i32) {
    %c0_i32 = arith.constant 0 : i32
    %c0_i32_0 = arith.constant 0 : i32
    %c0_i32_1 = arith.constant 0 : i32
    return %arg0, %c0_i32, %c0_i32_0 : i32, i32, i32
  }
  func.func @transform_1(%arg0: i32) -> (i32, i32) {
    %c0_i32 = arith.constant 0 : i32
    %c0_i32_0 = arith.constant 0 : i32
    %c0_i32_1 = arith.constant 0 : i32
    return %c0_i32, %c0_i32_0 : i32, i32
  }
  func.func @transform_2(%arg0: i32) -> (i32, i32) {
    %c0_i32 = arith.constant 0 : i32
    %c0_i32_0 = arith.constant 0 : i32
    %c0_i32_1 = arith.constant 0 : i32
    return %c0_i32, %c0_i32_0 : i32, i32
  }
  func.func @transform_3(%arg0: i32) -> (i32, i32) {
    %c0_i32 = arith.constant 0 : i32
    %c0_i32_0 = arith.constant 0 : i32
    %c0_i32_1 = arith.constant 0 : i32
    return %c0_i32, %c0_i32_0 : i32, i32
  }
  func.func @transform_4(%arg0: i32) -> (i32, i32) {
    %c0_i32 = arith.constant 0 : i32
    %c0_i32_0 = arith.constant 0 : i32
    %c0_i32_1 = arith.constant 0 : i32
    return %c0_i32, %c0_i32_0 : i32, i32
  }
  func.func @transform_5(%arg0: i32) -> (i32, i32, i32) {
    %c0_i32 = arith.constant 0 : i32
    %c0_i32_0 = arith.constant 0 : i32
    %c0_i32_1 = arith.constant 0 : i32
    return %arg0, %c0_i32, %c0_i32_0 : i32, i32, i32
  }
}

</mosaic_0001>

<bundles_post_ra>
// kernel: tpu_custom_call.1
= control target key start
LH: loop header
LB: loop body
LE: loop exit
PB: predicated region body
PF: predicated region fallthrough
CT: control target
= control target key end

     0   :  { %10 = vsyncpa [#allocation3], 0  ;;  %s1722_s0 = inlined_call_operand.hbm [shape: bf16[2,8,32], index: 0, kind: input, shape index: {}]   ;;  %s1723_s1 = inlined_call_operand.hbm [shape: bf16[32,96], index: 1, kind: input, shape index: {}]   ;;  %s1724_s2 = inlined_call_operand.vmem [shape: f32[1,96], index: 2, kind: input, shape index: {}]   ;;  %s1725_s3 = inlined_call_operand.hbm [shape: bf16[32,32], index: 3, kind: input, shape index: {}]   ;;  %s1726_s4 = inlined_call_operand.vmem [shape: f32[1,32], index: 4, kind: input, shape index: {}]   ;;  %s1727_s5 = inlined_call_operand.hbm [shape: f32[2,8,32], index: 5, kind: output, shape index: {}]  }
   0x1   :  { %12 = vsyncpa [#allocation3 + $0x1], 0 }
   0x2   :  { %13 = vsyncpa [#allocation6], 0 }
   0x3   :  { %14 = vsyncpa [#allocation4], 0 }
   0x4   :  { %16 = vsyncpa [#allocation4 + $0x1], 0  ;;  %s1412_s18 = smov 0   ;;  %s1414_s19 = smov 0  }
   0x5   :  { %s1416_s20 = smov 0   ;;  %s1418_s21 = smov 0  }
   0x6 LB: > { %s1433_s22 = sadd.s32 4294967295, %s1358_s21   ;;  %s979_s23 = sadd.s32 4294967294, %s1358_s21   ;;  %s1358_s21 = sphi %s1418_s21, %s1747_s21   ;;  %s1354_s20 = sphi %s1416_s20, %s1746_s20   ;;  %s1350_s19 = sphi %s1414_s19, %s1745_s19   ;;  %s1346_s18 = sphi %s1412_s18, %s1744_s18  }
   0x7   : > { %p42_p0 = scmp.ne.s32.totalorder %s1350_s19, %s1346_s18  ;;  %p1728_p1 = scmp.eq.s32.totalorder %s1433_s22, 0 }
   0x8   : > { %p156_p3 = scmp.eq.s32.totalorder %s979_s23, 1  ;;  %p980_p5 = scmp.ge.s32.totalorder %s1358_s21, 1 }
   0x9   : > { %p1442_p4 = por %p1728_p1, %p42_p0  ;;  %p163_p7 = scmp.lt.s32.totalorder %s1358_s21, 3 }
   0xa   : > { %p1447_p6 = por %p156_p3, %p42_p0  ;;  %s1360_s27 = smov [#allocation5]  }
   0xb   : > { %s1731_s24 = scalar_select %p1442_p4, 1, 0 }
   0xc   : > { %s1732_s25 = scalar_select %p1447_p6, 1, 0 }
   0xd   : > { %p1452_p8 = pnand %p980_p5, %p163_p7  ;;  %s175_s28 = sshll.u32 %s1360_s27, 4  ;;  %s1456_s28 = int_to_ptr.vmem [resolvable:$true] %s175_s28 }
   0xe   : > { %s1361_s30 = smov [#allocation7]   ;;  %s1202_s9 = scalar_lea.hbm %s1723_s1, 256 }
   0xf   : > { %p1109_p9 = pneg %p1452_p8  ;;  %s191_s6 = sshll.u32 %s1361_s30, 4  ;;  %s1467_s6 = int_to_ptr.vmem [resolvable:$true] %s191_s6 }
  0x10   : > { %p1203_p12 = scmp.ne.s32.totalorder %s1723_s1, %s1202_s9  ;;  %p1209_p5 = scmp.lt.u32.totalorder %s1202_s9, %s1723_s1 }
  0x11   : > { %p1463_p11 = pnand %p1109_p9, %p1728_p1 }
  0x13   : > { %p1204_p13 = pneg %p1463_p11 }
  0x15   : > { %p1205_p0 = pnand %p1204_p13, %p1203_p12 }
  0x17   : > { %p1206_p3 = pneg %p1205_p0 }
  0x19   : > { %p1211_p7 = pnand %p1209_p5, %p1206_p3 }
  0x1b   : > { %1214 = shalt.err (!%p1211_p7)
}
  0x1c   : > { %s1215_s14 = scalar_lea.vmem %s1456_s28, 256  ;;  %p1223_p2 = scmp.lt.s32.totalorder %s1456_s28, %s1456_s28 }
  0x1d   : > { %p1216_p9 = scmp.ne.s32.totalorder %s1456_s28, %s1215_s14  ;;  %p1224_p12 = scmp.lt.s32.totalorder %s1215_s14, %s1215_s14 }
  0x1f   : > { %p1218_p10 = pnand %p1216_p9, %p1204_p13  ;;  %p1225_p0 = por %p1224_p12, %p1223_p2 }
  0x21   : > { %p1219_p1 = pneg %p1218_p10 }
  0x23   : > { %p1226_p6 = pnand %p1225_p0, %p1219_p1 }
  0x25   : > { %1229 = shalt.err (!%p1226_p6)
}
  0x26   : > { %s1362_s15 = smov 64   ;;  %s1363_s16 = smov 4  }
  0x27   : > { %1112 = dma.hbm_to_vmem [thread:$0]  (!%p1463_p11), %s1723_s1, 256, %s1456_s28, [#allocation6], %s1362_s15, %s1362_s15, %s1363_s16  }
  0x28   : > { %s1230_s7 = scalar_lea.hbm %s1725_s3, 256 }
  0x29   : > { %p1231_p2 = scmp.ne.s32.totalorder %s1725_s3, %s1230_s7  ;;  %p1237_p10 = scmp.lt.u32.totalorder %s1230_s7, %s1725_s3 }
  0x2b   : > { %p1233_p1 = pnand %p1231_p2, %p1204_p13 }
  0x2d   : > { %p1234_p6 = pneg %p1233_p1 }
  0x2f   : > { %p1239_p3 = pnand %p1237_p10, %p1234_p6 }
  0x31   : > { %1242 = shalt.err (!%p1239_p3)
}
  0x32   : > { %s1243_s28 = scalar_lea.vmem %s1467_s6, 256  ;;  %p1251_p12 = scmp.lt.s32.totalorder %s1467_s6, %s1467_s6 }
  0x33   : > { %p1244_p5 = scmp.ne.s32.totalorder %s1467_s6, %s1243_s28  ;;  %p1252_p0 = scmp.lt.s32.totalorder %s1243_s28, %s1243_s28 }
  0x35   : > { %p1246_p7 = pnand %p1244_p5, %p1204_p13  ;;  %p1253_p2 = por %p1252_p0, %p1251_p12 }
  0x37   : > { %p1247_p9 = pneg %p1246_p7 }
  0x39   : > { %p1254_p1 = pnand %p1253_p2, %p1247_p9 }
  0x3b   : > { %1257 = shalt.err (!%p1254_p1)
}
  0x3c   : > { %1115 = dma.hbm_to_vmem [thread:$0]  (!%p1463_p11), %s1725_s3, 256, %s1467_s6, [#allocation6], %s1362_s15, %s1362_s15, %s1363_s16  }
  0x3d   : > { %s1522_s14 = sadd.s32 1, %s1358_s21   ;;  %s29_s29 = sadd.s32 1, %s1354_s20 }
  0x3e   : > { %s26_s17 = ssub.s32 %s1358_s21, %s1522_s14  ;;  %p36_p13 = scmp.ne.s32.totalorder %s1354_s20, %s1350_s19 }
  0x3f   : > { %p27_p6 = scmp.eq.s32.totalorder %s26_s17, 0  ;;  %p37_p10 = scmp.eq.s32.totalorder %s1358_s21, 0 }
  0x40   : > { %p1735_p3 = scmp.eq.s32.totalorder %s1433_s22, 1  ;;  %p1126_p7 = scmp.lt.s32.totalorder %s1358_s21, 2 }
  0x41   : > { %s1538_s27 = scalar_select %p27_p6, %s1354_s20, %s29_s29  }
  0x42   : > { %p1532_p5 = por %p1735_p3, %p36_p13  ;;  %p38_p9 = por %p37_p10, %p36_p13 }
  0x43   : > { %s208_s30 = sand.u32 1, %s1354_s20   ;;  %s985_s6 = sshll.u32 %s1358_s21, 6 }
  0x44   : > { %s1736_s23 = scalar_select %p1532_p5, 1, 0 }
  0x45   : > { %s984_s7 = sshll.u32 %s208_s30, 2  ;;  %s1545_s8 = scalar_lea.hbm %s1722_s0, %s985_s6 }
  0x46   : > { %s212_s9 = scalar_lea.vmem [#allocation2], %s984_s7  ;;  %p1549_p11 = pnand %p1126_p7, %p38_p9 }
  0x47   : > { %s219_s10 = sshll.u32 %s212_s9, 4  ;;  %s209_s28 = scalar_lea.sflag [#allocation3], %s208_s30  ;;  %s1547_s10 = int_to_ptr.vmem [resolvable:$true] %s219_s10 }
  0x48   : > { %s1258_s12 = scalar_lea.hbm %s1545_s8, 64  ;;  %p1260_p0 = pneg %p1549_p11 }
  0x49   : > { %p1259_p12 = scmp.ne.s32.totalorder %s1545_s8, %s1258_s12  ;;  %s1263_s17 = scalar_lea.hbm %s1722_s0, 128 }
  0x4a   : > { %p1264_p13 = scmp.lt.u32.totalorder %s1545_s8, %s1722_s0  ;;  %p1265_p6 = scmp.lt.u32.totalorder %s1263_s17, %s1258_s12 }
  0x4b   : > { %p1261_p2 = pnand %p1260_p0, %p1259_p12  ;;  %p1267_p3 = scmp.lt.u32.totalorder %s1258_s12, %s1545_s8 }
  0x4c   : > { %p1266_p10 = por %p1265_p6, %p1264_p13 }
  0x4d   : > { %p1262_p1 = pneg %p1261_p2 }
  0x4e   : > { %p1268_p7 = por %p1267_p3, %p1266_p10 }
  0x50   : > { %p1269_p9 = pnand %p1268_p7, %p1262_p1 }
  0x52   : > { %1272 = shalt.err (!%p1269_p9)
}
  0x53   : > { %s1273_s30 = scalar_lea.vmem %s1547_s10, 64  ;;  %s1364_s15 = smov [#allocation2]  }
  0x54   : > { %p1274_p12 = scmp.ne.s32.totalorder %s1547_s10, %s1273_s30  ;;  %s1278_s16 = sshll.u32 %s1364_s15, 4  ;;  %s1279_s16 = int_to_ptr.vmem [resolvable:$false] %s1278_s16 }
  0x55   : > { %s1280_s9 = scalar_lea.vmem %s1279_s16, 128  ;;  %p1281_p4 = scmp.lt.s32.totalorder %s1547_s10, %s1279_s16 }
  0x56   : > { %p1276_p2 = pnand %p1274_p12, %p1260_p0  ;;  %p1282_p13 = scmp.lt.s32.totalorder %s1280_s9, %s1273_s30 }
  0x58   : > { %p1277_p5 = pneg %p1276_p2  ;;  %p1283_p6 = por %p1282_p13, %p1281_p4 }
  0x5a   : > { %p1284_p10 = pnand %p1283_p6, %p1277_p5 }
  0x5c   : > { %1287 = shalt.err (!%p1284_p10)
}
  0x5d   : > { %1119 = dma.hbm_to_vmem [thread:$0]  (!%p1549_p11), %s1545_s8, 64, %s1547_s10, %s209_s28  }
  0x5e   : > { %228 = sbr.rel (%p1452_p8) target bundleno = 1440 (0x5a0), region = 40  ;;  %s1581_s12 = sand.u32 (!%p1452_p8), 1, %s1350_s19  }
  0x5f   : > { %s987_s13 = sshll.u32 (!%p1452_p8), %s1581_s12, 2  ;;  %s231_s29 = scalar_lea.sflag (!%p1452_p8), [#allocation3], %s1581_s12 }
  0x60   : > { %s234_s17 = scalar_lea.vmem (!%p1452_p8), [#allocation2], %s987_s13  ;;  %p1738_p4 = scmp.ne.s32.totalorder (!%p1452_p8), %s1731_s24, 0 }
  0x65   : > { %1333 = dma.done.wait (%p1738_p4), %s231_s29, 64  }
  0x66   : > { %1335 = vsyncadd (%p1738_p4), %s231_s29, 4294967232  ;;  %p1739_p5 = scmp.eq.s32.totalorder %s1433_s22, 0 }
  0x68   : > { %1337 = dma.done.wait (%p1739_p5), [#allocation6], 512   ;;  %p1740_p11 = pmov %p1739_p5 }
  0x69   : > { %v1365_v0 = vmov 0.0   ;;  %vm1366_vm0 = vmmov 0   ;;  %v1182_v1 = vld [vmem:[#allocation5] sm:$0xff]   ;;  %v1183_v2 = vld [vmem:[#allocation5 + $0x8] sm:$0xff]   ;;  %v270_v3 = vld [vmem:[%s234_s17] sm:$0xf] }
  0x6a   : > { %1339 = vsyncadd (%p1740_p11), [#allocation6], 4294966784  ;;  %1033 = vmatprep.subr.bf16.mxu0 %v1365_v0  ;;  %1037 = vmatprep.mubr.msk.bf16.mxu0 %vm1366_vm0, %v1365_v0  ;;  %vm294_vm1 = vcmask 261120   ;;  %v991_v4 = vld [vmem:[%s1724_s2] ss:$0 sm:$0xff]  ;;  %s1367_s8 = smov 120  }
  0x6b   : > { %1041 = vmatprep.subr.bf16.mxu1 %v1365_v0  ;;  %1043 = vmatprep.mubr.msk.bf16.mxu1 %vm1366_vm0, %v1365_v0  ;;  %s1368_s10 = smov 96   ;;  %s1369_s11 = smov 80   ;;  %vm342_vm2 = vcmask 64512   ;;  %vm407_vm3 = vcmask 1043456   ;;  %vm804_vm4 = vcmask 130048   ;;  %vm807_vm5 = vcmask 195584  }
  0x6c   : > { %1034 = vmatpush3.bf16.msra.mxu0 %v1182_v1  ;;  %s1370_s28 = smov 88   ;;  %s1371_s7 = smov 72  }
  0x6d   : > { %1035 = vmatprep.subr.bf16.mxu0 %v1365_v0  ;;  %s1372_s6 = smov 112   ;;  %s1373_s30 = smov 104  }
  0x6e   : > { %s1374_s15 = smov 56   ;;  %s1375_s16 = smov 64  }
  0x6f   : > { %s1376_s9 = smov 40   ;;  %s1377_s13 = smov 48  }
  0x70   : > { %1036 = vmatpush3.bf16.msra.mxu0 %v1183_v2  ;;  %s1378_s29 = smov 8   ;;  %s1379_s17 = smov 16  }
  0x71   : > { %1047 = vmatprep.subr.bf16.mxu0 %v1365_v0  ;;  %s1380_s24 = smov 24   ;;  %s990_s26 = sshll.u32 %s1581_s12, 3 }
  0x72   : > { %p1741_p0 = scmp.ne.s32.totalorder %s1736_s23, 0 }
  0x73   : > { %1038 = vmatmul.mubr.msk.bf16.vlgmr.msra.gmra.mrb[0].mxu0 %vm294_vm1, %v270_v3 }
  0x74   : > { %1049 = vmatprep.mubr.msk.bf16.mxu0 %vm1366_vm0, %v1365_v0 }
 0x146   : > { %v332_v5 = vpop.f32.mrb[0].mxu0 }
 0x147   : > { %v333_v6 = vadd.f32 %v991_v4, %v332_v5  ;;  %v1039_v7 = vpop.f32.mrb[1].mxu0 }
 0x148   : > { %v335_v8 = vpop.f32.mrb[2].mxu0 }
 0x149   : > { %v1607_v9 = vpack.c.bf16 %v333_v6, %v333_v6  ;;  %v1040_v10 = vpop.f32.mrb[3].mxu0 }
 0x14b   : > { %453 = vrot.lane.b32.xlu1 %v1607_v9, %s1367_s8  ;;  %340 = vrot.lane.b32.xlu0 %v1607_v9, %s1368_s10 }
 0x14f   : > { %568 = vrot.lane.b32.xlu1 %v1607_v9, %s1369_s11  ;;  %455 = vrot.lane.b32.xlu0 %v1607_v9, %s1370_s28  ;;  %s1008_s11 = sshll.u32 %s1433_s22, 7  ;;  %s268_s28 = scalar_lea.vmem [#allocation8], %s990_s26 }
 0x150   : > { %s877_s22 = scalar_lea.sflag [#allocation4], %s1581_s12 }
 0x153   : > { %681 = vrot.lane.b32.xlu1 %v1607_v9, %s1371_s7  ;;  %566 = vrot.lane.b32.xlu0 %v1607_v9, %s1372_s6  ;;  %s890_s7 = sshll.u32 %s268_s28, 4  ;;  %s1679_s7 = int_to_ptr.vmem [resolvable:$true] %s890_s7 }
 0x157   : > { %679 = vrot.lane.b32.xlu0 %v1607_v9, %s1373_s30 }
 0x1bd   : > { %v341_v11 = vpop.permute.xlu0 %340  ;;  %v454_v14 = vpop.permute.xlu1 %453 }
 0x1be   : > { %v347_v12 = vsel %vm342_vm2, %v341_v11, 0 }
 0x1bf   : > { %1042 = vmatpush3.bf16.xpose.msra.mxu1 %v347_v12 }
 0x1c0   : > { %1053 = vmatprep.subr.bf16.mxu1 %v1365_v0 }
 0x1c1   : > { %v456_v13 = vpop.permute.xlu0 %455  ;;  %v569_v16 = vpop.permute.xlu1 %568 }
 0x1c2   : > { %v461_v15 = vsel %vm342_vm2, %v456_v13, 0  ;;  %v574_v17 = vsel %vm342_vm2, %v569_v16, 0 }
 0x1c5   : > { %v682_v18 = vpop.permute.xlu1 %681  ;;  %v567_v19 = vpop.permute.xlu0 %566 }
 0x1c6   : > { %1044 = vmatmul.mubr.msk.bf16.vlgmr.msra.gmra.mrb[0].mxu1 %vm342_vm2, %v1607_v9  ;;  %v687_v20 = vsel %vm342_vm2, %v682_v18, 0 }
 0x1c7   : > { %1054 = vmatpush3.bf16.xpose.msra.mxu1 %v461_v15  ;;  %1055 = vmatprep.mubr.msk.bf16.mxu1 %vm1366_vm0, %v1365_v0 }
 0x1c8   : > { %1065 = vmatprep.subr.bf16.mxu1 %v1365_v0 }
 0x1c9   : > { %v680_v21 = vpop.permute.xlu0 %679 }
 0x1ce   : > { %1056 = vmatmul.mubr.msk.bf16.vlgmr.msra.gmra.mrb[4].mxu1 %vm342_vm2, %v454_v14 }
 0x1cf   : > { %1066 = vmatpush3.bf16.xpose.msra.mxu1 %v574_v17  ;;  %1067 = vmatprep.mubr.msk.bf16.mxu1 %vm1366_vm0, %v1365_v0 }
 0x1d0   : > { %1077 = vmatprep.subr.bf16.mxu1 %v1365_v0 }
 0x1d6   : > { %1068 = vmatmul.mubr.msk.bf16.vlgmr.msra.gmra.mrb[8].mxu1 %vm342_vm2, %v567_v19 }
 0x1d7   : > { %1078 = vmatpush3.bf16.xpose.msra.mxu1 %v687_v20  ;;  %1079 = vmatprep.mubr.msk.bf16.mxu1 %vm1366_vm0, %v1365_v0 }
 0x1d8   : > { %1089 = vmatprep.subr.bf16.mxu1 %v1365_v0 }
 0x1de   : > { %1080 = vmatmul.mubr.msk.bf16.vlgmr.msra.gmra.mrb[12].mxu1 %vm342_vm2, %v680_v21 }
 0x1df   : > { %1093 = vmatprep.mubr.msk.bf16.mxu1 %vm1366_vm0, %v1365_v0 }
 0x299   : > { %v383_v22 = vpop.f32.mrb[0].mxu1 }
 0x29a   : > { %v1045_v23 = vpop.f32.mrb[1].mxu1  ;;  %v389_v24 = vsel %vm342_vm2, %v383_v22, -inf }
 0x29b   : > { %390 = vmax.xlane.f32.xlu1 %v389_v24  ;;  %v386_v25 = vpop.f32.mrb[2].mxu1 }
 0x29c   : > { %v1046_v26 = vpop.f32.mrb[3].mxu1 }
 0x2a1   : > { %v497_v27 = vpop.f32.mrb[4].mxu1 }
 0x2a2   : > { %v1057_v28 = vpop.f32.mrb[5].mxu1  ;;  %v503_v29 = vsel %vm342_vm2, %v497_v27, -inf }
 0x2a3   : > { %504 = vmax.xlane.f32.xlu0 %v503_v29  ;;  %v500_v30 = vpop.f32.mrb[6].mxu1  ;;  %v1184_v28 = vld [vmem:[#allocation7] sm:$0xff]   ;;  %v1185_v29 = vld [vmem:[#allocation7 + $0x8] sm:$0xff]  }
 0x2a4   : > { %v1058_v31 = vpop.f32.mrb[7].mxu1  ;;  %1090 = vmatpush3.bf16.msra.mxu1 %v1184_v28 }
 0x2a5   : > { %1091 = vmatprep.subr.bf16.mxu1 %v1365_v0 }
 0x2a8   : > { %1092 = vmatpush3.bf16.msra.mxu1 %v1185_v29 }
 0x2a9   : > { %v610_v32 = vpop.f32.mrb[8].mxu1 }
 0x2aa   : > { %v1069_v33 = vpop.f32.mrb[9].mxu1  ;;  %v616_v34 = vsel %vm342_vm2, %v610_v32, -inf }
 0x2ab   : > { %617 = vmax.xlane.f32.xlu0 %v616_v34  ;;  %v613_v35 = vpop.f32.mrb[10].mxu1 }
 0x2ac   : > { %516 = vrot.lane.b32.xlu1 %v1607_v9, %s1374_s15  ;;  %v1070_v36 = vpop.f32.mrb[11].mxu1  ;;  %s1677_s15 = scalar_lea.hbm %s1727_s5, %s1008_s11 }
 0x2b1   : > { %v723_v37 = vpop.f32.mrb[12].mxu1 }
 0x2b2   : > { %v1081_v38 = vpop.f32.mrb[13].mxu1  ;;  %v729_v41 = vsel %vm342_vm2, %v723_v37, -inf }
 0x2b3   : > { %v726_v39 = vpop.f32.mrb[14].mxu1 }
 0x2b4   : > { %v1082_v40 = vpop.f32.mrb[15].mxu1 }
 0x2c1   : > { %402 = vrot.lane.b32.xlu0 %v1607_v9, %s1375_s16  ;;  %s1288_s16 = scalar_lea.vmem %s1679_s7, 128 }
 0x2c2   : > { %p1289_p8 = scmp.ne.s32.totalorder %s1679_s7, %s1288_s16 }
 0x2c4   : > { %p1290_p1 = pnand %p1289_p8, %p1741_p0 }
 0x2c5   : > { %742 = vrot.lane.b32.xlu0 %v1607_v9, %s1376_s9  ;;  %s1381_s9 = smov [#allocation8]  }
 0x2c6   : > { %p1291_p3 = pneg %p1290_p1 }
 0x2d0   : > { %730 = vmax.xlane.f32.xlu1 %v729_v41 }
 0x2e1   : > { %629 = vrot.lane.b32.xlu1 %v1607_v9, %s1377_s13  ;;  %s1292_s13 = sshll.u32 %s1381_s9, 4  ;;  %s1293_s13 = int_to_ptr.vmem [resolvable:$false] %s1292_s13 }
 0x2e2   : > { %p1295_p7 = scmp.lt.s32.totalorder %s1679_s7, %s1293_s13 }
 0x328   : > { %v391_v42 = vpop.xlane.xlu1 %390 }
 0x329   : > { %v392_v43 = vsub.f32 %v383_v22, %v391_v42 }
 0x32b   : > { %v393_v44 = vpack.c.bf16 %v392_v43, %v392_v43 }
 0x32c   : > { %v517_v56 = vpop.permute.xlu1 %516 }
 0x32d   : > { %v395_v46 = vmul.bf16 1069105081, %v393_v44  ;;  %v522_v58 = vsel %vm407_vm3, %v517_v56, 0 }
 0x32f   : > { %1186 = vpow.bf16 %v395_v46 }
 0x330   : > { %v505_v45 = vpop.xlane.xlu0 %504 }
 0x331   : > { %v506_v47 = vsub.f32 %v497_v27, %v505_v45 }
 0x333   : > { %v507_v48 = vpack.c.bf16 %v506_v47, %v506_v47 }
 0x335   : > { %v509_v49 = vmul.bf16 1069105081, %v507_v48 }
 0x337   : > { %1188 = vpow.bf16 %v509_v49 }
 0x338   : > { %v618_v50 = vpop.xlane.xlu0 %617 }
 0x339   : > { %v619_v51 = vsub.f32 %v610_v32, %v618_v50 }
 0x33a   : > { %v1187_v57 = vpop.eup %1186 }
 0x33b   : > { %v620_v52 = vpack.c.bf16 %v619_v51, %v619_v51  ;;  %v397_v62 = vunpack.c.l.bf16 %v1187_v57 }
 0x33c   : > { %v403_v53 = vpop.permute.xlu0 %402 }
 0x33d   : > { %v622_v54 = vmul.bf16 1069105081, %v620_v52  ;;  %v409_v55 = vsel %vm407_vm3, %v403_v53, 0  ;;  %v398_v63 = vsel %vm342_vm2, %v397_v62, 0.0 }
 0x33e   : > { %1048 = vmatpush3.bf16.msra.mxu0 %v409_v55 }
 0x33f   : > { %1190 = vpow.bf16 %v622_v54  ;;  %1059 = vmatprep.subr.bf16.mxu0 %v1365_v0  ;;  %v1003_v54 = vld [vmem:[%s1726_s4] ss:$0 sm:$0xff] }
 0x340   : > { %v743_v10 = vpop.permute.xlu0 %742 }
 0x341   : > { %1050 = vmatmul.mubr.msk.bf16.vlgmr.msra.gmra.mrb[4].mxu0 %vm342_vm2, %v1187_v57  ;;  %v748_v11 = vsel %vm407_vm3, %v743_v10, 0 }
 0x342   : > { %v1189_v59 = vpop.eup %1188  ;;  %1060 = vmatpush3.bf16.msra.mxu0 %v522_v58  ;;  %1061 = vmatprep.mubr.msk.bf16.mxu0 %vm1366_vm0, %v1365_v0 }
 0x343   : > { %v511_v60 = vunpack.c.l.bf16 %v1189_v59  ;;  %1071 = vmatprep.subr.bf16.mxu0 %v1365_v0 }
 0x345   : > { %v512_v61 = vsel %vm342_vm2, %v511_v60, 0.0 }
 0x346   : > { %513 = vadd.xlane.f32.xlu1 %v512_v61 }
 0x349   : > { %1062 = vmatmul.mubr.msk.bf16.vlgmr.msra.gmra.mrb[8].mxu0 %vm342_vm2, %v1189_v59 }
 0x34a   : > { %v1191_v1 = vpop.eup %1190  ;;  %399 = vadd.xlane.f32.xlu1 %v398_v63  ;;  %1073 = vmatprep.mubr.msk.bf16.mxu0 %vm1366_vm0, %v1365_v0 }
 0x34b   : > { %v624_v2 = vunpack.c.l.bf16 %v1191_v1 }
 0x34d   : > { %v625_v3 = vsel %vm342_vm2, %v624_v2, 0.0 }
 0x34e   : > { %626 = vadd.xlane.f32.xlu0 %v625_v3 }
 0x35d   : > { %v731_v4 = vpop.xlane.xlu1 %730 }
 0x35e   : > { %v732_v5 = vsub.f32 %v723_v37, %v731_v4 }
 0x360   : > { %v733_v6 = vpack.c.bf16 %v732_v5, %v732_v5 }
 0x361   : > { %v630_v7 = vpop.permute.xlu1 %629 }
 0x362   : > { %v735_v8 = vmul.bf16 1069105081, %v733_v6  ;;  %v635_v9 = vsel %vm407_vm3, %v630_v7, 0 }
 0x363   : > { %1072 = vmatpush3.bf16.msra.mxu0 %v635_v9 }
 0x364   : > { %1192 = vpow.bf16 %v735_v8  ;;  %1083 = vmatprep.subr.bf16.mxu0 %v1365_v0 }
 0x366   : > { %1074 = vmatmul.mubr.msk.bf16.vlgmr.msra.gmra.mrb[12].mxu0 %vm342_vm2, %v1191_v1 }
 0x367   : > { %1084 = vmatpush3.bf16.msra.mxu0 %v748_v11  ;;  %1085 = vmatprep.mubr.msk.bf16.mxu0 %vm1366_vm0, %v1365_v0 }
 0x36f   : > { %v1193_v12 = vpop.eup %1192 }
 0x370   : > { %1086 = vmatmul.mubr.msk.bf16.vlgmr.msra.gmra.mrb[16].mxu0 %vm342_vm2, %v1193_v12  ;;  %v737_v13 = vunpack.c.l.bf16 %v1193_v12 }
 0x372   : > { %v738_v14 = vsel %vm342_vm2, %v737_v13, 0.0 }
 0x373   : > { %739 = vadd.xlane.f32.xlu0 %v738_v14 }
 0x3d3   : > { %v514_v15 = vpop.xlane.xlu1 %513 }
 0x3d4   : > { %1194 = vrcp.f32 %v514_v15 }
 0x3d7   : > { %v400_v0 = vpop.xlane.xlu1 %399 }
 0x3db   : > { %v627_v27 = vpop.xlane.xlu0 %626 }
 0x3dc   : > { %1196 = vrcp.f32 %v627_v27 }
 0x3de   : > { %v1195_v20 = vpop.eup %1194 }
 0x3e6   : > { %v1197_v31 = vpop.eup %1196 }
 0x400   : > { %v740_v30 = vpop.xlane.xlu0 %739 }
 0x401   : > { %1198 = vrcp.f32 %v740_v30 }
 0x402   : > { %1200 = vrcp.f32 %v400_v0 }
 0x40b   : > { %v1199_v38 = vpop.eup %1198 }
 0x40c   : > { %v1201_v45 = vpop.eup %1200 }
 0x414   : > { %v445_v16 = vpop.f32.mrb[4].mxu0 }
 0x415   : > { %v1051_v17 = vpop.f32.mrb[5].mxu0  ;;  %v451_v46 = vmul.f32 %v1201_v45, %v445_v16 }
 0x416   : > { %v448_v18 = vpop.f32.mrb[6].mxu0 }
 0x417   : > { %v1052_v19 = vpop.f32.mrb[7].mxu0  ;;  %v452_v49 = vpack.c.bf16 %v451_v46, %v451_v46 }
 0x41c   : > { %v558_v21 = vpop.f32.mrb[8].mxu0 }
 0x41d   : > { %v564_v22 = vmul.f32 %v1195_v20, %v558_v21  ;;  %v1063_v23 = vpop.f32.mrb[9].mxu0 }
 0x41e   : > { %v561_v24 = vpop.f32.mrb[10].mxu0 }
 0x41f   : > { %v565_v25 = vpack.c.bf16 %v564_v22, %v564_v22  ;;  %v1064_v26 = vpop.f32.mrb[11].mxu0 }
 0x421   : > { %793 = vrot.lane.b32.xlu0 %v565_v25, %s1378_s29  ;;  %s1294_s29 = scalar_lea.vmem %s1293_s13, 256 }
 0x422   : > { %p1296_p9 = scmp.lt.s32.totalorder %s1294_s29, %s1288_s16 }
 0x424   : > { %p1297_p12 = por %p1296_p9, %p1295_p7 }
 0x426   : > { %p1298_p2 = pnand %p1297_p12, %p1291_p3 }
 0x439   : > { %v671_v32 = vpop.f32.mrb[12].mxu0 }
 0x43a   : > { %v677_v33 = vmul.f32 %v1197_v31, %v671_v32  ;;  %v1075_v34 = vpop.f32.mrb[13].mxu0 }
 0x43b   : > { %v674_v35 = vpop.f32.mrb[14].mxu0 }
 0x43c   : > { %v678_v36 = vpack.c.bf16 %v677_v33, %v677_v33  ;;  %v1076_v37 = vpop.f32.mrb[15].mxu0 }
 0x43e   : > { %796 = vrot.lane.b32.xlu1 %v678_v36, %s1379_s17 }
 0x443   : > { %v784_v39 = vpop.f32.mrb[16].mxu0 }
 0x444   : > { %v790_v40 = vmul.f32 %v1199_v38, %v784_v39  ;;  %v1087_v41 = vpop.f32.mrb[17].mxu0 }
 0x445   : > { %v787_v42 = vpop.f32.mrb[18].mxu0 }
 0x446   : > { %v791_v43 = vpack.c.bf16 %v790_v40, %v790_v40  ;;  %v1088_v44 = vpop.f32.mrb[19].mxu0 }
 0x448   : > { %799 = vrot.lane.b32.xlu1 %v791_v43, %s1380_s24 }
 0x493   : > { %v794_v47 = vpop.permute.xlu0 %793 }
 0x494   : > { %v803_v50 = vsel %vm342_vm2, %v452_v49, %v794_v47 }
 0x4b0   : > { %v797_v48 = vpop.permute.xlu1 %796 }
 0x4b1   : > { %v806_v51 = vsel %vm804_vm4, %v803_v50, %v797_v48 }
 0x4ba   : > { %v800_v52 = vpop.permute.xlu1 %799 }
 0x4bb   : > { %v809_v53 = vsel %vm807_vm5, %v806_v51, %v800_v52 }
 0x4bc   : > { %1094 = vmatmul.mubr.msk.bf16.vlgmr.msra.gmra.mrb[16].mxu1 %vm294_vm1, %v809_v53 }
 0x58f   : > { %v869_v55 = vpop.f32.mrb[16].mxu1 }
 0x590   : > { %v870_v56 = vadd.f32 %v1003_v54, %v869_v55  ;;  %v1095_v57 = vpop.f32.mrb[17].mxu1 }
 0x591   : > { %v872_v58 = vpop.f32.mrb[18].mxu1 }
 0x592   : > { %v1096_v59 = vpop.f32.mrb[19].mxu1  ;;  %875 = vst.msk [vmem:[%s268_s28] sm:$0xff] %vm294_vm1, %v870_v56 }
 0x593   : > { %1301 = shalt.err (!%p1298_p2)
}
 0x594   : > { %s1302_s12 = scalar_lea.hbm %s1677_s15, 128  ;;  %s1306_s26 = scalar_lea.hbm %s1727_s5, 256 }
 0x595   : > { %p1303_p13 = scmp.ne.s32.totalorder %s1677_s15, %s1302_s12  ;;  %p1307_p4 = scmp.lt.u32.totalorder %s1677_s15, %s1727_s5 }
 0x596   : > { %p1308_p5 = scmp.lt.u32.totalorder %s1306_s26, %s1302_s12  ;;  %p1310_p8 = scmp.lt.u32.totalorder %s1302_s12, %s1677_s15 }
 0x597   : > { %p1304_p6 = pnand %p1303_p13, %p1741_p0 }
 0x598   : > { %p1309_p11 = por %p1308_p5, %p1307_p4 }
 0x599   : > { %p1305_p10 = pneg %p1304_p6 }
 0x59a   : > { %p1311_p1 = por %p1310_p8, %p1309_p11 }
 0x59c   : > { %p1312_p3 = pnand %p1311_p1, %p1305_p10 }
 0x59e   : > { %1315 = shalt.err (!%p1312_p3)
}
 0x59f   : > { %1107 = dma.vmem_to_hbm [thread:$0]  (%p1741_p0), %s1679_s7, 128, %s1677_s15, %s877_s22  }
 0x5a0 PF: > { %s902_s11 = sand.u32 1, %s1346_s18   ;;  %p1742_p7 = scmp.ne.s32.totalorder %s1732_s25, 0 }
 0x5a1   : > { %p1743_p9 = scmp.ge.s32.totalorder %s1358_s21, 2  ;;  %s903_s28 = scalar_lea.sflag [#allocation4], %s902_s11 }
 0x5a3   : > { %p1121_p12 = pnand %p1743_p9, %p1742_p7 }
 0x5a5   : > { %1341 = dma.done.wait (!%p1121_p12), %s903_s28, 128  }
 0x5a6   : > { %1343 = vsyncadd (!%p1121_p12), %s903_s28, 4294967168  ;;  %p19_p2 = scmp.ge.s32.totalorder %s1522_s14, 4   ;;  %s1744_s18 = smov %s1350_s19 }
 0x5a7   : > { %s1745_s19 = smov %s1354_s20  ;;  %s1746_s20 = smov %s1538_s27 }
 0x5a8   : > { %s1747_s21 = smov %s1522_s14  ;;  %21 = sbr.rel (!%p19_p2) target bundleno = 6 (0x6), region = 93 }
 0x5af   :  { %908 = vsyncpa [#allocation3], 1 }
 0x5b0   :  { %910 = vsyncpa [#allocation3 + $0x1], 1 }
 0x5b1   :  { %911 = vsyncpa [#allocation6], 1 }
 0x5b2   :  { %912 = vsyncpa [#allocation4], 1 }
 0x5b3   :  { %914 = vsyncpa [#allocation4 + $0x1], 1 }

// kernel: tpu_custom_call.1
= control target key start
LH: loop header
LB: loop body
LE: loop exit
PB: predicated region body
PF: predicated region fallthrough
CT: control target
= control target key end

     0   :  { %10 = vsyncpa [#allocation3], 0  ;;  %s1722_s0 = inlined_call_operand.hbm [shape: bf16[2,8,32], index: 0, kind: input, shape index: {}]   ;;  %s1723_s1 = inlined_call_operand.hbm [shape: bf16[32,96], index: 1, kind: input, shape index: {}]   ;;  %s1724_s2 = inlined_call_operand.vmem [shape: f32[1,96], index: 2, kind: input, shape index: {}]   ;;  %s1725_s3 = inlined_call_operand.hbm [shape: bf16[32,32], index: 3, kind: input, shape index: {}]   ;;  %s1726_s4 = inlined_call_operand.vmem [shape: f32[1,32], index: 4, kind: input, shape index: {}]   ;;  %s1727_s5 = inlined_call_operand.hbm [shape: f32[2,8,32], index: 5, kind: output, shape index: {}]  }
   0x1   :  { %12 = vsyncpa [#allocation3 + $0x1], 0 }
   0x2   :  { %13 = vsyncpa [#allocation6], 0 }
   0x3   :  { %14 = vsyncpa [#allocation4], 0 }
   0x4   :  { %16 = vsyncpa [#allocation4 + $0x1], 0  ;;  %s1412_s18 = smov 0   ;;  %s1414_s19 = smov 0  }
   0x5   :  { %s1416_s20 = smov 0   ;;  %s1418_s21 = smov 0  }
   0x6 LB: > { %s1433_s22 = sadd.s32 4294967295, %s1358_s21   ;;  %s979_s23 = sadd.s32 4294967294, %s1358_s21   ;;  %s1358_s21 = sphi %s1418_s21, %s1747_s21   ;;  %s1354_s20 = sphi %s1416_s20, %s1746_s20   ;;  %s1350_s19 = sphi %s1414_s19, %s1745_s19   ;;  %s1346_s18 = sphi %s1412_s18, %s1744_s18  }
   0x7   : > { %p42_p0 = scmp.ne.s32.totalorder %s1350_s19, %s1346_s18  ;;  %p1728_p1 = scmp.eq.s32.totalorder %s1433_s22, 0 }
   0x8   : > { %p156_p3 = scmp.eq.s32.totalorder %s979_s23, 1  ;;  %p980_p5 = scmp.ge.s32.totalorder %s1358_s21, 1 }
   0x9   : > { %p1442_p4 = por %p1728_p1, %p42_p0  ;;  %p163_p7 = scmp.lt.s32.totalorder %s1358_s21, 3 }
   0xa   : > { %p1447_p6 = por %p156_p3, %p42_p0  ;;  %s1360_s27 = smov [#allocation5]  }
   0xb   : > { %s1731_s24 = scalar_select %p1442_p4, 1, 0 }
   0xc   : > { %s1732_s25 = scalar_select %p1447_p6, 1, 0 }
   0xd   : > { %p1452_p8 = pnand %p980_p5, %p163_p7  ;;  %s175_s28 = sshll.u32 %s1360_s27, 4  ;;  %s1456_s28 = int_to_ptr.vmem [resolvable:$true] %s175_s28 }
   0xe   : > { %s1361_s30 = smov [#allocation7]   ;;  %s1202_s9 = scalar_lea.hbm %s1723_s1, 256 }
   0xf   : > { %p1109_p9 = pneg %p1452_p8  ;;  %s191_s6 = sshll.u32 %s1361_s30, 4  ;;  %s1467_s6 = int_to_ptr.vmem [resolvable:$true] %s191_s6 }
  0x10   : > { %p1203_p12 = scmp.ne.s32.totalorder %s1723_s1, %s1202_s9  ;;  %p1209_p5 = scmp.lt.u32.totalorder %s1202_s9, %s1723_s1 }
  0x11   : > { %p1463_p11 = pnand %p1109_p9, %p1728_p1 }
  0x13   : > { %p1204_p13 = pneg %p1463_p11 }
  0x15   : > { %p1205_p0 = pnand %p1204_p13, %p1203_p12 }
  0x17   : > { %p1206_p3 = pneg %p1205_p0 }
  0x19   : > { %p1211_p7 = pnand %p1209_p5, %p1206_p3 }
  0x1b   : > { %1214 = shalt.err (!%p1211_p7)
}
  0x1c   : > { %s1215_s14 = scalar_lea.vmem %s1456_s28, 256  ;;  %p1223_p2 = scmp.lt.s32.totalorder %s1456_s28, %s1456_s28 }
  0x1d   : > { %p1216_p9 = scmp.ne.s32.totalorder %s1456_s28, %s1215_s14  ;;  %p1224_p12 = scmp.lt.s32.totalorder %s1215_s14, %s1215_s14 }
  0x1f   : > { %p1218_p10 = pnand %p1216_p9, %p1204_p13  ;;  %p1225_p0 = por %p1224_p12, %p1223_p2 }
  0x21   : > { %p1219_p1 = pneg %p1218_p10 }
  0x23   : > { %p1226_p6 = pnand %p1225_p0, %p1219_p1 }
  0x25   : > { %1229 = shalt.err (!%p1226_p6)
}
  0x26   : > { %s1362_s15 = smov 64   ;;  %s1363_s16 = smov 4  }
  0x27   : > { %1112 = dma.hbm_to_vmem [thread:$0]  (!%p1463_p11), %s1723_s1, 256, %s1456_s28, [#allocation6], %s1362_s15, %s1362_s15, %s1363_s16  }
  0x28   : > { %s1230_s7 = scalar_lea.hbm %s1725_s3, 256 }
  0x29   : > { %p1231_p2 = scmp.ne.s32.totalorder %s1725_s3, %s1230_s7  ;;  %p1237_p10 = scmp.lt.u32.totalorder %s1230_s7, %s1725_s3 }
  0x2b   : > { %p1233_p1 = pnand %p1231_p2, %p1204_p13 }
  0x2d   : > { %p1234_p6 = pneg %p1233_p1 }
  0x2f   : > { %p1239_p3 = pnand %p1237_p10, %p1234_p6 }
  0x31   : > { %1242 = shalt.err (!%p1239_p3)
}
  0x32   : > { %s1243_s28 = scalar_lea.vmem %s1467_s6, 256  ;;  %p1251_p12 = scmp.lt.s32.totalorder %s1467_s6, %s1467_s6 }
  0x33   : > { %p1244_p5 = scmp.ne.s32.totalorder %s1467_s6, %s1243_s28  ;;  %p1252_p0 = scmp.lt.s32.totalorder %s1243_s28, %s1243_s28 }
  0x35   : > { %p1246_p7 = pnand %p1244_p5, %p1204_p13  ;;  %p1253_p2 = por %p1252_p0, %p1251_p12 }
  0x37   : > { %p1247_p9 = pneg %p1246_p7 }
  0x39   : > { %p1254_p1 = pnand %p1253_p2, %p1247_p9 }
  0x3b   : > { %1257 = shalt.err (!%p1254_p1)
}
  0x3c   : > { %1115 = dma.hbm_to_vmem [thread:$0]  (!%p1463_p11), %s1725_s3, 256, %s1467_s6, [#allocation6], %s1362_s15, %s1362_s15, %s1363_s16  }
  0x3d   : > { %s1522_s14 = sadd.s32 1, %s1358_s21   ;;  %s29_s29 = sadd.s32 1, %s1354_s20 }
  0x3e   : > { %s26_s17 = ssub.s32 %s1358_s21, %s1522_s14  ;;  %p36_p13 = scmp.ne.s32.totalorder %s1354_s20, %s1350_s19 }
  0x3f   : > { %p27_p6 = scmp.eq.s32.totalorder %s26_s17, 0  ;;  %p37_p10 = scmp.eq.s32.totalorder %s1358_s21, 0 }
  0x40   : > { %p1735_p3 = scmp.eq.s32.totalorder %s1433_s22, 1  ;;  %p1126_p7 = scmp.lt.s32.totalorder %s1358_s21, 2 }
  0x41   : > { %s1538_s27 = scalar_select %p27_p6, %s1354_s20, %s29_s29  }
  0x42   : > { %p1532_p5 = por %p1735_p3, %p36_p13  ;;  %p38_p9 = por %p37_p10, %p36_p13 }
  0x43   : > { %s208_s30 = sand.u32 1, %s1354_s20   ;;  %s985_s6 = sshll.u32 %s1358_s21, 6 }
  0x44   : > { %s1736_s23 = scalar_select %p1532_p5, 1, 0 }
  0x45   : > { %s984_s7 = sshll.u32 %s208_s30, 2  ;;  %s1545_s8 = scalar_lea.hbm %s1722_s0, %s985_s6 }
  0x46   : > { %s212_s9 = scalar_lea.vmem [#allocation2], %s984_s7  ;;  %p1549_p11 = pnand %p1126_p7, %p38_p9 }
  0x47   : > { %s219_s10 = sshll.u32 %s212_s9, 4  ;;  %s209_s28 = scalar_lea.sflag [#allocation3], %s208_s30  ;;  %s1547_s10 = int_to_ptr.vmem [resolvable:$true] %s219_s10 }
  0x48   : > { %s1258_s12 = scalar_lea.hbm %s1545_s8, 64  ;;  %p1260_p0 = pneg %p1549_p11 }
  0x49   : > { %p1259_p12 = scmp.ne.s32.totalorder %s1545_s8, %s1258_s12  ;;  %s1263_s17 = scalar_lea.hbm %s1722_s0, 128 }
  0x4a   : > { %p1264_p13 = scmp.lt.u32.totalorder %s1545_s8, %s1722_s0  ;;  %p1265_p6 = scmp.lt.u32.totalorder %s1263_s17, %s1258_s12 }
  0x4b   : > { %p1261_p2 = pnand %p1260_p0, %p1259_p12  ;;  %p1267_p3 = scmp.lt.u32.totalorder %s1258_s12, %s1545_s8 }
  0x4c   : > { %p1266_p10 = por %p1265_p6, %p1264_p13 }
  0x4d   : > { %p1262_p1 = pneg %p1261_p2 }
  0x4e   : > { %p1268_p7 = por %p1267_p3, %p1266_p10 }
  0x50   : > { %p1269_p9 = pnand %p1268_p7, %p1262_p1 }
  0x52   : > { %1272 = shalt.err (!%p1269_p9)
}
  0x53   : > { %s1273_s30 = scalar_lea.vmem %s1547_s10, 64  ;;  %s1364_s15 = smov [#allocation2]  }
  0x54   : > { %p1274_p12 = scmp.ne.s32.totalorder %s1547_s10, %s1273_s30  ;;  %s1278_s16 = sshll.u32 %s1364_s15, 4  ;;  %s1279_s16 = int_to_ptr.vmem [resolvable:$false] %s1278_s16 }
  0x55   : > { %s1280_s9 = scalar_lea.vmem %s1279_s16, 128  ;;  %p1281_p4 = scmp.lt.s32.totalorder %s1547_s10, %s1279_s16 }
  0x56   : > { %p1276_p2 = pnand %p1274_p12, %p1260_p0  ;;  %p1282_p13 = scmp.lt.s32.totalorder %s1280_s9, %s1273_s30 }
  0x58   : > { %p1277_p5 = pneg %p1276_p2  ;;  %p1283_p6 = por %p1282_p13, %p1281_p4 }
  0x5a   : > { %p1284_p10 = pnand %p1283_p6, %p1277_p5 }
  0x5c   : > { %1287 = shalt.err (!%p1284_p10)
}
  0x5d   : > { %1119 = dma.hbm_to_vmem [thread:$0]  (!%p1549_p11), %s1545_s8, 64, %s1547_s10, %s209_s28  }
  0x5e   : > { %228 = sbr.rel (%p1452_p8) target bundleno = 1440 (0x5a0), region = 40  ;;  %s1581_s12 = sand.u32 (!%p1452_p8), 1, %s1350_s19  }
  0x5f   : > { %s987_s13 = sshll.u32 (!%p1452_p8), %s1581_s12, 2  ;;  %s231_s29 = scalar_lea.sflag (!%p1452_p8), [#allocation3], %s1581_s12 }
  0x60   : > { %s234_s17 = scalar_lea.vmem (!%p1452_p8), [#allocation2], %s987_s13  ;;  %p1738_p4 = scmp.ne.s32.totalorder (!%p1452_p8), %s1731_s24, 0 }
  0x65   : > { %1333 = dma.done.wait (%p1738_p4), %s231_s29, 64  }
  0x66   : > { %1335 = vsyncadd (%p1738_p4), %s231_s29, 4294967232  ;;  %p1739_p5 = scmp.eq.s32.totalorder %s1433_s22, 0 }
  0x68   : > { %1337 = dma.done.wait (%p1739_p5), [#allocation6], 512   ;;  %p1740_p11 = pmov %p1739_p5 }
  0x69   : > { %v1365_v0 = vmov 0.0   ;;  %vm1366_vm0 = vmmov 0   ;;  %v1182_v1 = vld [vmem:[#allocation5] sm:$0xff]   ;;  %v1183_v2 = vld [vmem:[#allocation5 + $0x8] sm:$0xff]   ;;  %v270_v3 = vld [vmem:[%s234_s17] sm:$0xf] }
  0x6a   : > { %1339 = vsyncadd (%p1740_p11), [#allocation6], 4294966784  ;;  %1033 = vmatprep.subr.bf16.mxu0 %v1365_v0  ;;  %1037 = vmatprep.mubr.msk.bf16.mxu0 %vm1366_vm0, %v1365_v0  ;;  %vm294_vm1 = vcmask 261120   ;;  %v991_v4 = vld [vmem:[%s1724_s2] ss:$0 sm:$0xff]  ;;  %s1367_s8 = smov 120  }
  0x6b   : > { %1041 = vmatprep.subr.bf16.mxu1 %v1365_v0  ;;  %1043 = vmatprep.mubr.msk.bf16.mxu1 %vm1366_vm0, %v1365_v0  ;;  %s1368_s10 = smov 96   ;;  %s1369_s11 = smov 80   ;;  %vm342_vm2 = vcmask 64512   ;;  %vm407_vm3 = vcmask 1043456   ;;  %vm804_vm4 = vcmask 130048   ;;  %vm807_vm5 = vcmask 195584  }
  0x6c   : > { %1034 = vmatpush3.bf16.msra.mxu0 %v1182_v1  ;;  %s1370_s28 = smov 88   ;;  %s1371_s7 = smov 72  }
  0x6d   : > { %1035 = vmatprep.subr.bf16.mxu0 %v1365_v0  ;;  %s1372_s6 = smov 112   ;;  %s1373_s30 = smov 104  }
  0x6e   : > { %s1374_s15 = smov 56   ;;  %s1375_s16 = smov 64  }
  0x6f   : > { %s1376_s9 = smov 40   ;;  %s1377_s13 = smov 48  }
  0x70   : > { %1036 = vmatpush3.bf16.msra.mxu0 %v1183_v2  ;;  %s1378_s29 = smov 8   ;;  %s1379_s17 = smov 16  }
  0x71   : > { %1047 = vmatprep.subr.bf16.mxu0 %v1365_v0  ;;  %s1380_s24 = smov 24   ;;  %s990_s26 = sshll.u32 %s1581_s12, 3 }
  0x72   : > { %p1741_p0 = scmp.ne.s32.totalorder %s1736_s23, 0 }
  0x73   : > { %1038 = vmatmul.mubr.msk.bf16.vlgmr.msra.gmra.mrb[0].mxu0 %vm294_vm1, %v270_v3 }
  0x74   : > { %1049 = vmatprep.mubr.msk.bf16.mxu0 %vm1366_vm0, %v1365_v0 }
 0x146   : > { %v332_v5 = vpop.f32.mrb[0].mxu0 }
 0x147   : > { %v333_v6 = vadd.f32 %v991_v4, %v332_v5  ;;  %v1039_v7 = vpop.f32.mrb[1].mxu0 }
 0x148   : > { %v335_v8 = vpop.f32.mrb[2].mxu0 }
 0x149   : > { %v1607_v9 = vpack.c.bf16 %v333_v6, %v333_v6  ;;  %v1040_v10 = vpop.f32.mrb[3].mxu0 }
 0x14b   : > { %453 = vrot.lane.b32.xlu1 %v1607_v9, %s1367_s8  ;;  %340 = vrot.lane.b32.xlu0 %v1607_v9, %s1368_s10 }
 0x14f   : > { %568 = vrot.lane.b32.xlu1 %v1607_v9, %s1369_s11  ;;  %455 = vrot.lane.b32.xlu0 %v1607_v9, %s1370_s28  ;;  %s1008_s11 = sshll.u32 %s1433_s22, 7  ;;  %s268_s28 = scalar_lea.vmem [#allocation8], %s990_s26 }
 0x150   : > { %s877_s22 = scalar_lea.sflag [#allocation4], %s1581_s12 }
 0x153   : > { %681 = vrot.lane.b32.xlu1 %v1607_v9, %s1371_s7  ;;  %566 = vrot.lane.b32.xlu0 %v1607_v9, %s1372_s6  ;;  %s890_s7 = sshll.u32 %s268_s28, 4  ;;  %s1679_s7 = int_to_ptr.vmem [resolvable:$true] %s890_s7 }
 0x157   : > { %679 = vrot.lane.b32.xlu0 %v1607_v9, %s1373_s30 }
 0x1bd   : > { %v341_v11 = vpop.permute.xlu0 %340  ;;  %v454_v14 = vpop.permute.xlu1 %453 }
 0x1be   : > { %v347_v12 = vsel %vm342_vm2, %v341_v11, 0 }
 0x1bf   : > { %1042 = vmatpush3.bf16.xpose.msra.mxu1 %v347_v12 }
 0x1c0   : > { %1053 = vmatprep.subr.bf16.mxu1 %v1365_v0 }
 0x1c1   : > { %v456_v13 = vpop.permute.xlu0 %455  ;;  %v569_v16 = vpop.permute.xlu1 %568 }
 0x1c2   : > { %v461_v15 = vsel %vm342_vm2, %v456_v13, 0  ;;  %v574_v17 = vsel %vm342_vm2, %v569_v16, 0 }
 0x1c5   : > { %v682_v18 = vpop.permute.xlu1 %681  ;;  %v567_v19 = vpop.permute.xlu0 %566 }
 0x1c6   : > { %1044 = vmatmul.mubr.msk.bf16.vlgmr.msra.gmra.mrb[0].mxu1 %vm342_vm2, %v1607_v9  ;;  %v687_v20 = vsel %vm342_vm2, %v682_v18, 0 }
 0x1c7   : > { %1054 = vmatpush3.bf16.xpose.msra.mxu1 %v461_v15  ;;  %1055 = vmatprep.mubr.msk.bf16.mxu1 %vm1366_vm0, %v1365_v0 }
 0x1c8   : > { %1065 = vmatprep.subr.bf16.mxu1 %v1365_v0 }
 0x1c9   : > { %v680_v21 = vpop.permute.xlu0 %679 }
 0x1ce   : > { %1056 = vmatmul.mubr.msk.bf16.vlgmr.msra.gmra.mrb[4].mxu1 %vm342_vm2, %v454_v14 }
 0x1cf   : > { %1066 = vmatpush3.bf16.xpose.msra.mxu1 %v574_v17  ;;  %1067 = vmatprep.mubr.msk.bf16.mxu1 %vm1366_vm0, %v1365_v0 }
 0x1d0   : > { %1077 = vmatprep.subr.bf16.mxu1 %v1365_v0 }
 0x1d6   : > { %1068 = vmatmul.mubr.msk.bf16.vlgmr.msra.gmra.mrb[8].mxu1 %vm342_vm2, %v567_v19 }
 0x1d7   : > { %1078 = vmatpush3.bf16.xpose.msra.mxu1 %v687_v20  ;;  %1079 = vmatprep.mubr.msk.bf16.mxu1 %vm1366_vm0, %v1365_v0 }
 0x1d8   : > { %1089 = vmatprep.subr.bf16.mxu1 %v1365_v0 }
 0x1de   : > { %1080 = vmatmul.mubr.msk.bf16.vlgmr.msra.gmra.mrb[12].mxu1 %vm342_vm2, %v680_v21 }
 0x1df   : > { %1093 = vmatprep.mubr.msk.bf16.mxu1 %vm1366_vm0, %v1365_v0 }
 0x299   : > { %v383_v22 = vpop.f32.mrb[0].mxu1 }
 0x29a   : > { %v1045_v23 = vpop.f32.mrb[1].mxu1  ;;  %v389_v24 = vsel %vm342_vm2, %v383_v22, -inf }
 0x29b   : > { %390 = vmax.xlane.f32.xlu1 %v389_v24  ;;  %v386_v25 = vpop.f32.mrb[2].mxu1 }
 0x29c   : > { %v1046_v26 = vpop.f32.mrb[3].mxu1 }
 0x2a1   : > { %v497_v27 = vpop.f32.mrb[4].mxu1 }
 0x2a2   : > { %v1057_v28 = vpop.f32.mrb[5].mxu1  ;;  %v503_v29 = vsel %vm342_vm2, %v497_v27, -inf }
 0x2a3   : > { %504 = vmax.xlane.f32.xlu0 %v503_v29  ;;  %v500_v30 = vpop.f32.mrb[6].mxu1  ;;  %v1184_v28 = vld [vmem:[#allocation7] sm:$0xff]   ;;  %v1185_v29 = vld [vmem:[#allocation7 + $0x8] sm:$0xff]  }
 0x2a4   : > { %v1058_v31 = vpop.f32.mrb[7].mxu1  ;;  %1090 = vmatpush3.bf16.msra.mxu1 %v1184_v28 }
 0x2a5   : > { %1091 = vmatprep.subr.bf16.mxu1 %v1365_v0 }
 0x2a8   : > { %1092 = vmatpush3.bf16.msra.mxu1 %v1185_v29 }
 0x2a9   : > { %v610_v32 = vpop.f32.mrb[8].mxu1 }
 0x2aa   : > { %v1069_v33 = vpop.f32.mrb[9].mxu1  ;;  %v616_v34 = vsel %vm342_vm2, %v610_v32, -inf }
 0x2ab   : > { %617 = vmax.xlane.f32.xlu0 %v616_v34  ;;  %v613_v35 = vpop.f32.mrb[10].mxu1 }
 0x2ac   : > { %516 = vrot.lane.b32.xlu1 %v1607_v9, %s1374_s15  ;;  %v1070_v36 = vpop.f32.mrb[11].mxu1  ;;  %s1677_s15 = scalar_lea.hbm %s1727_s5, %s1008_s11 }
 0x2b1   : > { %v723_v37 = vpop.f32.mrb[12].mxu1 }
 0x2b2   : > { %v1081_v38 = vpop.f32.mrb[13].mxu1  ;;  %v729_v41 = vsel %vm342_vm2, %v723_v37, -inf }
 0x2b3   : > { %v726_v39 = vpop.f32.mrb[14].mxu1 }
 0x2b4   : > { %v1082_v40 = vpop.f32.mrb[15].mxu1 }
 0x2c1   : > { %402 = vrot.lane.b32.xlu0 %v1607_v9, %s1375_s16  ;;  %s1288_s16 = scalar_lea.vmem %s1679_s7, 128 }
 0x2c2   : > { %p1289_p8 = scmp.ne.s32.totalorder %s1679_s7, %s1288_s16 }
 0x2c4   : > { %p1290_p1 = pnand %p1289_p8, %p1741_p0 }
 0x2c5   : > { %742 = vrot.lane.b32.xlu0 %v1607_v9, %s1376_s9  ;;  %s1381_s9 = smov [#allocation8]  }
 0x2c6   : > { %p1291_p3 = pneg %p1290_p1 }
 0x2d0   : > { %730 = vmax.xlane.f32.xlu1 %v729_v41 }
 0x2e1   : > { %629 = vrot.lane.b32.xlu1 %v1607_v9, %s1377_s13  ;;  %s1292_s13 = sshll.u32 %s1381_s9, 4  ;;  %s1293_s13 = int_to_ptr.vmem [resolvable:$false] %s1292_s13 }
 0x2e2   : > { %p1295_p7 = scmp.lt.s32.totalorder %s1679_s7, %s1293_s13 }
 0x328   : > { %v391_v42 = vpop.xlane.xlu1 %390 }
 0x329   : > { %v392_v43 = vsub.f32 %v383_v22, %v391_v42 }
 0x32b   : > { %v393_v44 = vpack.c.bf16 %v392_v43, %v392_v43 }
 0x32c   : > { %v517_v56 = vpop.permute.xlu1 %516 }
 0x32d   : > { %v395_v46 = vmul.bf16 1069105081, %v393_v44  ;;  %v522_v58 = vsel %vm407_vm3, %v517_v56, 0 }
 0x32f   : > { %1186 = vpow.bf16 %v395_v46 }
 0x330   : > { %v505_v45 = vpop.xlane.xlu0 %504 }
 0x331   : > { %v506_v47 = vsub.f32 %v497_v27, %v505_v45 }
 0x333   : > { %v507_v48 = vpack.c.bf16 %v506_v47, %v506_v47 }
 0x335   : > { %v509_v49 = vmul.bf16 1069105081, %v507_v48 }
 0x337   : > { %1188 = vpow.bf16 %v509_v49 }
 0x338   : > { %v618_v50 = vpop.xlane.xlu0 %617 }
 0x339   : > { %v619_v51 = vsub.f32 %v610_v32, %v618_v50 }
 0x33a   : > { %v1187_v57 = vpop.eup %1186 }
 0x33b   : > { %v620_v52 = vpack.c.bf16 %v619_v51, %v619_v51  ;;  %v397_v62 = vunpack.c.l.bf16 %v1187_v57 }
 0x33c   : > { %v403_v53 = vpop.permute.xlu0 %402 }
 0x33d   : > { %v622_v54 = vmul.bf16 1069105081, %v620_v52  ;;  %v409_v55 = vsel %vm407_vm3, %v403_v53, 0  ;;  %v398_v63 = vsel %vm342_vm2, %v397_v62, 0.0 }
 0x33e   : > { %1048 = vmatpush3.bf16.msra.mxu0 %v409_v55 }
 0x33f   : > { %1190 = vpow.bf16 %v622_v54  ;;  %1059 = vmatprep.subr.bf16.mxu0 %v1365_v0  ;;  %v1003_v54 = vld [vmem:[%s1726_s4] ss:$0 sm:$0xff] }
 0x340   : > { %v743_v10 = vpop.permute.xlu0 %742 }
 0x341   : > { %1050 = vmatmul.mubr.msk.bf16.vlgmr.msra.gmra.mrb[4].mxu0 %vm342_vm2, %v1187_v57  ;;  %v748_v11 = vsel %vm407_vm3, %v743_v10, 0 }
 0x342   : > { %v1189_v59 = vpop.eup %1188  ;;  %1060 = vmatpush3.bf16.msra.mxu0 %v522_v58  ;;  %1061 = vmatprep.mubr.msk.bf16.mxu0 %vm1366_vm0, %v1365_v0 }
 0x343   : > { %v511_v60 = vunpack.c.l.bf16 %v1189_v59  ;;  %1071 = vmatprep.subr.bf16.mxu0 %v1365_v0 }
 0x345   : > { %v512_v61 = vsel %vm342_vm2, %v511_v60, 0.0 }
 0x346   : > { %513 = vadd.xlane.f32.xlu1 %v512_v61 }
 0x349   : > { %1062 = vmatmul.mubr.msk.bf16.vlgmr.msra.gmra.mrb[8].mxu0 %vm342_vm2, %v1189_v59 }
 0x34a   : > { %v1191_v1 = vpop.eup %1190  ;;  %399 = vadd.xlane.f32.xlu1 %v398_v63  ;;  %1073 = vmatprep.mubr.msk.bf16.mxu0 %vm1366_vm0, %v1365_v0 }
 0x34b   : > { %v624_v2 = vunpack.c.l.bf16 %v1191_v1 }
 0x34d   : > { %v625_v3 = vsel %vm342_vm2, %v624_v2, 0.0 }
 0x34e   : > { %626 = vadd.xlane.f32.xlu0 %v625_v3 }
 0x35d   : > { %v731_v4 = vpop.xlane.xlu1 %730 }
 0x35e   : > { %v732_v5 = vsub.f32 %v723_v37, %v731_v4 }
 0x360   : > { %v733_v6 = vpack.c.bf16 %v732_v5, %v732_v5 }
 0x361   : > { %v630_v7 = vpop.permute.xlu1 %629 }
 0x362   : > { %v735_v8 = vmul.bf16 1069105081, %v733_v6  ;;  %v635_v9 = vsel %vm407_vm3, %v630_v7, 0 }
 0x363   : > { %1072 = vmatpush3.bf16.msra.mxu0 %v635_v9 }
 0x364   : > { %1192 = vpow.bf16 %v735_v8  ;;  %1083 = vmatprep.subr.bf16.mxu0 %v1365_v0 }
 0x366   : > { %1074 = vmatmul.mubr.msk.bf16.vlgmr.msra.gmra.mrb[12].mxu0 %vm342_vm2, %v1191_v1 }
 0x367   : > { %1084 = vmatpush3.bf16.msra.mxu0 %v748_v11  ;;  %1085 = vmatprep.mubr.msk.bf16.mxu0 %vm1366_vm0, %v1365_v0 }
 0x36f   : > { %v1193_v12 = vpop.eup %1192 }
 0x370   : > { %1086 = vmatmul.mubr.msk.bf16.vlgmr.msra.gmra.mrb[16].mxu0 %vm342_vm2, %v1193_v12  ;;  %v737_v13 = vunpack.c.l.bf16 %v1193_v12 }
 0x372   : > { %v738_v14 = vsel %vm342_vm2, %v737_v13, 0.0 }
 0x373   : > { %739 = vadd.xlane.f32.xlu0 %v738_v14 }
 0x3d3   : > { %v514_v15 = vpop.xlane.xlu1 %513 }
 0x3d4   : > { %1194 = vrcp.f32 %v514_v15 }
 0x3d7   : > { %v400_v0 = vpop.xlane.xlu1 %399 }
 0x3db   : > { %v627_v27 = vpop.xlane.xlu0 %626 }
 0x3dc   : > { %1196 = vrcp.f32 %v627_v27 }
 0x3de   : > { %v1195_v20 = vpop.eup %1194 }
 0x3e6   : > { %v1197_v31 = vpop.eup %1196 }
 0x400   : > { %v740_v30 = vpop.xlane.xlu0 %739 }
 0x401   : > { %1198 = vrcp.f32 %v740_v30 }
 0x402   : > { %1200 = vrcp.f32 %v400_v0 }
 0x40b   : > { %v1199_v38 = vpop.eup %1198 }
 0x40c   : > { %v1201_v45 = vpop.eup %1200 }
 0x414   : > { %v445_v16 = vpop.f32.mrb[4].mxu0 }
 0x415   : > { %v1051_v17 = vpop.f32.mrb[5].mxu0  ;;  %v451_v46 = vmul.f32 %v1201_v45, %v445_v16 }
 0x416   : > { %v448_v18 = vpop.f32.mrb[6].mxu0 }
 0x417   : > { %v1052_v19 = vpop.f32.mrb[7].mxu0  ;;  %v452_v49 = vpack.c.bf16 %v451_v46, %v451_v46 }
 0x41c   : > { %v558_v21 = vpop.f32.mrb[8].mxu0 }
 0x41d   : > { %v564_v22 = vmul.f32 %v1195_v20, %v558_v21  ;;  %v1063_v23 = vpop.f32.mrb[9].mxu0 }
 0x41e   : > { %v561_v24 = vpop.f32.mrb[10].mxu0 }
 0x41f   : > { %v565_v25 = vpack.c.bf16 %v564_v22, %v564_v22  ;;  %v1064_v26 = vpop.f32.mrb[11].mxu0 }
 0x421   : > { %793 = vrot.lane.b32.xlu0 %v565_v25, %s1378_s29  ;;  %s1294_s29 = scalar_lea.vmem %s1293_s13, 256 }
 0x422   : > { %p1296_p9 = scmp.lt.s32.totalorder %s1294_s29, %s1288_s16 }
 0x424   : > { %p1297_p12 = por %p1296_p9, %p1295_p7 }
 0x426   : > { %p1298_p2 = pnand %p1297_p12, %p1291_p3 }
 0x439   : > { %v671_v32 = vpop.f32.mrb[12].mxu0 }
 0x43a   : > { %v677_v33 = vmul.f32 %v1197_v31, %v671_v32  ;;  %v1075_v34 = vpop.f32.mrb[13].mxu0 }
 0x43b   : > { %v674_v35 = vpop.f32.mrb[14].mxu0 }
 0x43c   : > { %v678_v36 = vpack.c.bf16 %v677_v33, %v677_v33  ;;  %v1076_v37 = vpop.f32.mrb[15].mxu0 }
 0x43e   : > { %796 = vrot.lane.b32.xlu1 %v678_v36, %s1379_s17 }
 0x443   : > { %v784_v39 = vpop.f32.mrb[16].mxu0 }
 0x444   : > { %v790_v40 = vmul.f32 %v1199_v38, %v784_v39  ;;  %v1087_v41 = vpop.f32.mrb[17].mxu0 }
 0x445   : > { %v787_v42 = vpop.f32.mrb[18].mxu0 }
 0x446   : > { %v791_v43 = vpack.c.bf16 %v790_v40, %v790_v40  ;;  %v1088_v44 = vpop.f32.mrb[19].mxu0 }
 0x448   : > { %799 = vrot.lane.b32.xlu1 %v791_v43, %s1380_s24 }
 0x493   : > { %v794_v47 = vpop.permute.xlu0 %793 }
 0x494   : > { %v803_v50 = vsel %vm342_vm2, %v452_v49, %v794_v47 }
 0x4b0   : > { %v797_v48 = vpop.permute.xlu1 %796 }
 0x4b1   : > { %v806_v51 = vsel %vm804_vm4, %v803_v50, %v797_v48 }
 0x4ba   : > { %v800_v52 = vpop.permute.xlu1 %799 }
 0x4bb   : > { %v809_v53 = vsel %vm807_vm5, %v806_v51, %v800_v52 }
 0x4bc   : > { %1094 = vmatmul.mubr.msk.bf16.vlgmr.msra.gmra.mrb[16].mxu1 %vm294_vm1, %v809_v53 }
 0x58f   : > { %v869_v55 = vpop.f32.mrb[16].mxu1 }
 0x590   : > { %v870_v56 = vadd.f32 %v1003_v54, %v869_v55  ;;  %v1095_v57 = vpop.f32.mrb[17].mxu1 }
 0x591   : > { %v872_v58 = vpop.f32.mrb[18].mxu1 }
 0x592   : > { %v1096_v59 = vpop.f32.mrb[19].mxu1  ;;  %875 = vst.msk [vmem:[%s268_s28] sm:$0xff] %vm294_vm1, %v870_v56 }
 0x593   : > { %1301 = shalt.err (!%p1298_p2)
}
 0x594   : > { %s1302_s12 = scalar_lea.hbm %s1677_s15, 128  ;;  %s1306_s26 = scalar_lea.hbm %s1727_s5, 256 }
 0x595   : > { %p1303_p13 = scmp.ne.s32.totalorder %s1677_s15, %s1302_s12  ;;  %p1307_p4 = scmp.lt.u32.totalorder %s1677_s15, %s1727_s5 }
 0x596   : > { %p1308_p5 = scmp.lt.u32.totalorder %s1306_s26, %s1302_s12  ;;  %p1310_p8 = scmp.lt.u32.totalorder %s1302_s12, %s1677_s15 }
 0x597   : > { %p1304_p6 = pnand %p1303_p13, %p1741_p0 }
 0x598   : > { %p1309_p11 = por %p1308_p5, %p1307_p4 }
 0x599   : > { %p1305_p10 = pneg %p1304_p6 }
 0x59a   : > { %p1311_p1 = por %p1310_p8, %p1309_p11 }
 0x59c   : > { %p1312_p3 = pnand %p1311_p1, %p1305_p10 }
 0x59e   : > { %1315 = shalt.err (!%p1312_p3)
}
 0x59f   : > { %1107 = dma.vmem_to_hbm [thread:$0]  (%p1741_p0), %s1679_s7, 128, %s1677_s15, %s877_s22  }
 0x5a0 PF: > { %s902_s11 = sand.u32 1, %s1346_s18   ;;  %p1742_p7 = scmp.ne.s32.totalorder %s1732_s25, 0 }
 0x5a1   : > { %p1743_p9 = scmp.ge.s32.totalorder %s1358_s21, 2  ;;  %s903_s28 = scalar_lea.sflag [#allocation4], %s902_s11 }
 0x5a3   : > { %p1121_p12 = pnand %p1743_p9, %p1742_p7 }
 0x5a5   : > { %1341 = dma.done.wait (!%p1121_p12), %s903_s28, 128  }
 0x5a6   : > { %1343 = vsyncadd (!%p1121_p12), %s903_s28, 4294967168  ;;  %p19_p2 = scmp.ge.s32.totalorder %s1522_s14, 4   ;;  %s1744_s18 = smov %s1350_s19 }
 0x5a7   : > { %s1745_s19 = smov %s1354_s20  ;;  %s1746_s20 = smov %s1538_s27 }
 0x5a8   : > { %s1747_s21 = smov %s1522_s14  ;;  %21 = sbr.rel (!%p19_p2) target bundleno = 6 (0x6), region = 93 }
 0x5af   :  { %908 = vsyncpa [#allocation3], 1 }
 0x5b0   :  { %910 = vsyncpa [#allocation3 + $0x1], 1 }
 0x5b1   :  { %911 = vsyncpa [#allocation6], 1 }
 0x5b2   :  { %912 = vsyncpa [#allocation4], 1 }
 0x5b3   :  { %914 = vsyncpa [#allocation4 + $0x1], 1 }

</bundles_post_ra>
